<compile_context>
chip_gen: v7x
topology: tpu7x:2x2x1
jax: 0.10.0
libtpu: 0.0.40
codegen_flags: <defaults>
</compile_context>

<pallas_src>
import jax
import jax.numpy as jnp
from jax.experimental import pallas as pl
from jax.experimental.pallas import tpu as pltpu

# ---- problem sizes (from SmallBPModel.__init__) ----
SIG_LEN = 1250            # ppg / vpg / apg / ecg length
INFO_LEN = 5              # personal_info length
D_IN = 4 * SIG_LEN + INFO_LEN   # 5005
H1 = 128
H2 = 64
D_OUT = 1

# ---- TPU-friendly lane-padded sizes ----
H2_PAD = 128              # lane-dense layer-2 activations
D_OUT_PAD = 128           # lane-dense output tile


def _mlp_kernel(ppg_ref, vpg_ref, apg_ref, ecg_ref, info_ref,
                w1_ppg_ref, w1_vpg_ref, w1_apg_ref, w1_ecg_ref, w1_info_ref,
                b1_ref, w2_ref, b2_ref, w3_ref, b3_ref, o_ref):
    """relu(x@W1+b1) -> relu(.@W2+b2) -> .@W3+b3, with the input concat fused
    into the kernel as five partial dots; bf16 MXU path, f32 accumulation."""
    f32 = jnp.float32
    bf16 = jnp.bfloat16

    # ---- layer 1: concat fused as partial dots against W1 row-blocks ----
    h1 = jnp.dot(ppg_ref[...].astype(bf16), w1_ppg_ref[...],
                 preferred_element_type=f32)
    h1 = h1 + jnp.dot(vpg_ref[...].astype(bf16), w1_vpg_ref[...],
                      preferred_element_type=f32)
    h1 = h1 + jnp.dot(apg_ref[...].astype(bf16), w1_apg_ref[...],
                      preferred_element_type=f32)
    h1 = h1 + jnp.dot(ecg_ref[...].astype(bf16), w1_ecg_ref[...],
                      preferred_element_type=f32)
    h1 = h1 + jnp.dot(info_ref[...].astype(bf16), w1_info_ref[...],
                      preferred_element_type=f32)
    h1 = jnp.maximum(h1 + b1_ref[...], 0.0)

    # ---- layer 2: (B,128) @ (128,128) -- H2 zero-padded to 128 lanes ----
    h2 = jnp.dot(h1.astype(bf16), w2_ref[...], preferred_element_type=f32)
    h2 = jnp.maximum(h2 + b2_ref[...], 0.0)

    # ---- layer 3: lane-padded to N=128 so the store is a dense 128-lane vst ----
    o_ref[...] = jnp.dot(h2.astype(bf16), w3_ref[...],
                         preferred_element_type=f32) + b3_ref[...]


@jax.jit
def small_bp_model_forward(ppg, vpg, apg, ecg, personal_info, params):
    """Pallas equivalent of SmallBPModel.forward.

    Inputs: ppg/vpg/apg/ecg: (B, 1250) f32, personal_info: (B, 5) f32.
    params: output of prepare_params() (pre-split / pre-padded / pre-cast weights).
    Returns: (B, 1) float32.
    """
    (w1_ppg, w1_vpg, w1_apg, w1_ecg, w1_info,
     b1, w2_pad, b2_pad, w3_pad, b3_pad) = params
    B = ppg.shape[0]

    def full(shape):
        # single-step grid: every array is one full-extent block
        return pl.BlockSpec(shape, lambda i: (0,) * len(shape))

    out_pad = pl.pallas_call(
        _mlp_kernel,
        out_shape=jax.ShapeDtypeStruct((B, D_OUT_PAD), jnp.float32),
        grid_spec=pltpu.PrefetchScalarGridSpec(
            num_scalar_prefetch=0,
            grid=(1,),
            in_specs=[
                # raw f32 inputs (concat fused into the kernel)
                full((B, SIG_LEN)),          # ppg
                full((B, SIG_LEN)),          # vpg
                full((B, SIG_LEN)),          # apg
                full((B, SIG_LEN)),          # ecg
                full((B, INFO_LEN)),         # personal_info
                # W1 row-blocks, bf16 (prepared once)
                full((SIG_LEN, H1)),         # W1[0:1250]
                full((SIG_LEN, H1)),         # W1[1250:2500]
                full((SIG_LEN, H1)),         # W1[2500:3750]
                full((SIG_LEN, H1)),         # W1[3750:5000]
                full((INFO_LEN, H1)),        # W1[5000:5005]
                full((1, H1)),               # b1 (f32)
                full((H1, H2_PAD)),          # W2 (bf16, lane-padded to 128)
                full((1, H2_PAD)),           # b2 (f32, lane-padded)
                full((H2_PAD, D_OUT_PAD)),   # W3 (bf16, padded to 128x128)
                full((1, D_OUT_PAD)),        # b3 (f32, lane-padded)
            ],
            out_specs=full((B, D_OUT_PAD)),
        ),
        compiler_params=pltpu.CompilerParams(
            dimension_semantics=("arbitrary",),
        ),
    )(ppg, vpg, apg, ecg, personal_info,
      w1_ppg, w1_vpg, w1_apg, w1_ecg, w1_info,
      b1, w2_pad, b2_pad, w3_pad, b3_pad)

    return out_pad[:, :D_OUT]


def init_params(key):
    """Raw f32 params mirroring nn.Linear init (weights stored transposed: (in, out))."""
    ks = jax.random.split(key, 6)

    def linear(kw, kb, fan_in, fan_out):
        bound = 1.0 / jnp.sqrt(fan_in)
        w = jax.random.uniform(kw, (fan_in, fan_out), jnp.float32, -bound, bound)
        b = jax.random.uniform(kb, (1, fan_out), jnp.float32, -bound, bound)
        return w, b

    w1, b1 = linear(ks[0], ks[1], D_IN, H1)
    w2, b2 = linear(ks[2], ks[3], H1, H2)
    w3, b3 = linear(ks[4], ks[5], H2, D_OUT)
    return (w1, b1, w2, b2, w3, b3)


def prepare_params(raw):
    """One-time split / pad / bf16 cast of the weights (NOT per forward call)."""
    w1, b1, w2, b2, w3, b3 = raw
    bf16 = jnp.bfloat16
    # split W1 into per-input row blocks (fuses the input concat into the kernel)
    w1_ppg = w1[0 * SIG_LEN:1 * SIG_LEN].astype(bf16)
    w1_vpg = w1[1 * SIG_LEN:2 * SIG_LEN].astype(bf16)
    w1_apg = w1[2 * SIG_LEN:3 * SIG_LEN].astype(bf16)
    w1_ecg = w1[3 * SIG_LEN:4 * SIG_LEN].astype(bf16)
    w1_info = w1[4 * SIG_LEN:4 * SIG_LEN + INFO_LEN].astype(bf16)
    # lane-pad H2 / D_OUT to 128 (zeros contribute nothing; relu(0+0)=0)
    w2_pad = jnp.zeros((H1, H2_PAD), bf16).at[:, :H2].set(w2.astype(bf16))
    b2_pad = jnp.zeros((1, H2_PAD), jnp.float32).at[:, :H2].set(b2)
    w3_pad = jnp.zeros((H2_PAD, D_OUT_PAD), bf16).at[:H2, :D_OUT].set(w3.astype(bf16))
    b3_pad = jnp.zeros((1, D_OUT_PAD), jnp.float32).at[:, :D_OUT].set(b3)
    return (w1_ppg, w1_vpg, w1_apg, w1_ecg, w1_info,
            b1, w2_pad, b2_pad, w3_pad, b3_pad)


def _reference_f32(ppg, vpg, apg, ecg, personal_info, raw):
    """True f32 SmallBPModel.forward (matches the PyTorch module)."""
    w1, b1, w2, b2, w3, b3 = raw
    x = jnp.concatenate((ppg, vpg, apg, ecg, personal_info), axis=1)
    h1 = jnp.maximum(x @ w1 + b1, 0.0)
    h2 = jnp.maximum(h1 @ w2 + b2, 0.0)
    return h2 @ w3 + b3


def _reference_bf16(ppg, vpg, apg, ecg, personal_info, raw):
    """Reference matched to the kernel's numerics (bf16 operands, f32 accumulation)."""
    w1, b1, w2, b2, w3, b3 = raw
    b = lambda a: a.astype(jnp.bfloat16).astype(jnp.float32)
    x = jnp.concatenate((ppg, vpg, apg, ecg, personal_info), axis=1)
    h1 = jnp.maximum(b(x) @ b(w1) + b1, 0.0)
    h2 = jnp.maximum(b(h1) @ b(w2) + b2, 0.0)
    return b(h2) @ b(w3) + b3


if __name__ == "__main__":
    key = jax.random.PRNGKey(0)
    k_params, k_ppg, k_vpg, k_apg, k_ecg, k_info = jax.random.split(key, 6)

    B = 2
    ppg = jax.random.normal(k_ppg, (B, SIG_LEN), jnp.float32)
    vpg = jax.random.normal(k_vpg, (B, SIG_LEN), jnp.float32)
    apg = jax.random.normal(k_apg, (B, SIG_LEN), jnp.float32)
    ecg = jax.random.normal(k_ecg, (B, SIG_LEN), jnp.float32)
    personal_info = jax.random.normal(k_info, (B, INFO_LEN), jnp.float32)

    raw = init_params(k_params)
    params = prepare_params(raw)

    out = small_bp_model_forward(ppg, vpg, apg, ecg, personal_info, params)
    out = jax.block_until_ready(out)
    assert out.shape == (B, D_OUT), out.shape

    # Tight check vs a numerics-matched (bf16-operand) reference.
    ref16 = _reference_bf16(ppg, vpg, apg, ecg, personal_info, raw)
    assert jnp.allclose(out, ref16, atol=2e-3, rtol=2e-2), \
        f"mismatch vs bf16-matched reference: {out} vs {ref16}"

    # Looser check vs the true f32 model (quantization error of the bf16 path).
    ref32 = _reference_f32(ppg, vpg, apg, ecg, personal_info, raw)
    assert jnp.allclose(out, ref32, atol=5e-2, rtol=5e-2), \
        f"mismatch vs f32 reference: {out} vs {ref32}"

    print("KERNEL_OK")
</pallas_src>

<mosaic_0001>
module attributes {stable_mosaic.version = 11 : i64} {
  func.func @_mlp_kernel(%arg0: i32, %arg1: memref<2x1250xf32, #tpu.memory_space<vmem>>, %arg2: memref<2x1250xf32, #tpu.memory_space<vmem>>, %arg3: memref<2x1250xf32, #tpu.memory_space<vmem>>, %arg4: memref<2x1250xf32, #tpu.memory_space<vmem>>, %arg5: memref<2x5xf32, #tpu.memory_space<vmem>>, %arg6: memref<1250x128xbf16, #tpu.memory_space<vmem>>, %arg7: memref<1250x128xbf16, #tpu.memory_space<vmem>>, %arg8: memref<1250x128xbf16, #tpu.memory_space<vmem>>, %arg9: memref<1250x128xbf16, #tpu.memory_space<vmem>>, %arg10: memref<5x128xbf16, #tpu.memory_space<vmem>>, %arg11: memref<1x128xf32, #tpu.memory_space<vmem>>, %arg12: memref<128x128xbf16, #tpu.memory_space<vmem>>, %arg13: memref<1x128xf32, #tpu.memory_space<vmem>>, %arg14: memref<128x128xbf16, #tpu.memory_space<vmem>>, %arg15: memref<1x128xf32, #tpu.memory_space<vmem>>, %arg16: memref<2x128xf32, #tpu.memory_space<vmem>>) attributes {dimension_semantics = [#tpu.dimension_semantics<arbitrary>], iteration_bounds = array<i64: 1>, scalar_prefetch = 0 : i64, scratch_operands = 0 : i64, tpu.core_type = #tpu.core_type<tc>, window_params = [{pipeline_mode = #tpu.pipeline_mode<synchronous>, transform_indices = @transform_0, window_bounds = array<i64: 2, 1250>}, {pipeline_mode = #tpu.pipeline_mode<synchronous>, transform_indices = @transform_1, window_bounds = array<i64: 2, 1250>}, {pipeline_mode = #tpu.pipeline_mode<synchronous>, transform_indices = @transform_2, window_bounds = array<i64: 2, 1250>}, {pipeline_mode = #tpu.pipeline_mode<synchronous>, transform_indices = @transform_3, window_bounds = array<i64: 2, 1250>}, {pipeline_mode = #tpu.pipeline_mode<synchronous>, transform_indices = @transform_4, window_bounds = array<i64: 2, 5>}, {pipeline_mode = #tpu.pipeline_mode<synchronous>, transform_indices = @transform_5, window_bounds = array<i64: 1250, 128>}, {pipeline_mode = #tpu.pipeline_mode<synchronous>, transform_indices = @transform_6, window_bounds = array<i64: 1250, 128>}, {pipeline_mode = #tpu.pipeline_mode<synchronous>, transform_indices = @transform_7, window_bounds = array<i64: 1250, 128>}, {pipeline_mode = #tpu.pipeline_mode<synchronous>, transform_indices = @transform_8, window_bounds = array<i64: 1250, 128>}, {pipeline_mode = #tpu.pipeline_mode<synchronous>, transform_indices = @transform_9, window_bounds = array<i64: 5, 128>}, {pipeline_mode = #tpu.pipeline_mode<synchronous>, transform_indices = @transform_10, window_bounds = array<i64: 1, 128>}, {pipeline_mode = #tpu.pipeline_mode<synchronous>, transform_indices = @transform_11, window_bounds = array<i64: 128, 128>}, {pipeline_mode = #tpu.pipeline_mode<synchronous>, transform_indices = @transform_12, window_bounds = array<i64: 1, 128>}, {pipeline_mode = #tpu.pipeline_mode<synchronous>, transform_indices = @transform_13, window_bounds = array<i64: 128, 128>}, {pipeline_mode = #tpu.pipeline_mode<synchronous>, transform_indices = @transform_14, window_bounds = array<i64: 1, 128>}, {pipeline_mode = #tpu.pipeline_mode<synchronous>, transform_indices = @transform_15, window_bounds = array<i64: 2, 128>}]} {
    %c0 = arith.constant 0 : index
    %c0_0 = arith.constant 0 : index
    %0 = vector.load %arg1[%c0, %c0_0] : memref<2x1250xf32, #tpu.memory_space<vmem>>, vector<2x1250xf32>
    %1 = arith.truncf %0 : vector<2x1250xf32> to vector<2x1250xbf16>
    %c0_1 = arith.constant 0 : index
    %c0_2 = arith.constant 0 : index
    %2 = vector.load %arg6[%c0_1, %c0_2] : memref<1250x128xbf16, #tpu.memory_space<vmem>>, vector<1250x128xbf16>
    %cst = arith.constant dense<0.000000e+00> : vector<2x128xf32>
    %3 = tpu.matmul %1, %2, %cst {dimension_numbers = #tpu.dot_dimension_numbers<[1], [0], [0], [1], [0, 0, 1, 1], [], []>} : vector<2x1250xbf16>, vector<1250x128xbf16>, vector<2x128xf32> -> vector<2x128xf32>
    %c0_3 = arith.constant 0 : index
    %c0_4 = arith.constant 0 : index
    %4 = vector.load %arg2[%c0_3, %c0_4] : memref<2x1250xf32, #tpu.memory_space<vmem>>, vector<2x1250xf32>
    %5 = arith.truncf %4 : vector<2x1250xf32> to vector<2x1250xbf16>
    %c0_5 = arith.constant 0 : index
    %c0_6 = arith.constant 0 : index
    %6 = vector.load %arg7[%c0_5, %c0_6] : memref<1250x128xbf16, #tpu.memory_space<vmem>>, vector<1250x128xbf16>
    %cst_7 = arith.constant dense<0.000000e+00> : vector<2x128xf32>
    %7 = tpu.matmul %5, %6, %cst_7 {dimension_numbers = #tpu.dot_dimension_numbers<[1], [0], [0], [1], [0, 0, 1, 1], [], []>} : vector<2x1250xbf16>, vector<1250x128xbf16>, vector<2x128xf32> -> vector<2x128xf32>
    %8 = arith.addf %3, %7 : vector<2x128xf32>
    %c0_8 = arith.constant 0 : index
    %c0_9 = arith.constant 0 : index
    %9 = vector.load %arg3[%c0_8, %c0_9] : memref<2x1250xf32, #tpu.memory_space<vmem>>, vector<2x1250xf32>
    %10 = arith.truncf %9 : vector<2x1250xf32> to vector<2x1250xbf16>
    %c0_10 = arith.constant 0 : index
    %c0_11 = arith.constant 0 : index
    %11 = vector.load %arg8[%c0_10, %c0_11] : memref<1250x128xbf16, #tpu.memory_space<vmem>>, vector<1250x128xbf16>
    %cst_12 = arith.constant dense<0.000000e+00> : vector<2x128xf32>
    %12 = tpu.matmul %10, %11, %cst_12 {dimension_numbers = #tpu.dot_dimension_numbers<[1], [0], [0], [1], [0, 0, 1, 1], [], []>} : vector<2x1250xbf16>, vector<1250x128xbf16>, vector<2x128xf32> -> vector<2x128xf32>
    %13 = arith.addf %8, %12 : vector<2x128xf32>
    %c0_13 = arith.constant 0 : index
    %c0_14 = arith.constant 0 : index
    %14 = vector.load %arg4[%c0_13, %c0_14] : memref<2x1250xf32, #tpu.memory_space<vmem>>, vector<2x1250xf32>
    %15 = arith.truncf %14 : vector<2x1250xf32> to vector<2x1250xbf16>
    %c0_15 = arith.constant 0 : index
    %c0_16 = arith.constant 0 : index
    %16 = vector.load %arg9[%c0_15, %c0_16] : memref<1250x128xbf16, #tpu.memory_space<vmem>>, vector<1250x128xbf16>
    %cst_17 = arith.constant dense<0.000000e+00> : vector<2x128xf32>
    %17 = tpu.matmul %15, %16, %cst_17 {dimension_numbers = #tpu.dot_dimension_numbers<[1], [0], [0], [1], [0, 0, 1, 1], [], []>} : vector<2x1250xbf16>, vector<1250x128xbf16>, vector<2x128xf32> -> vector<2x128xf32>
    %18 = arith.addf %13, %17 : vector<2x128xf32>
    %c0_18 = arith.constant 0 : index
    %c0_19 = arith.constant 0 : index
    %19 = vector.load %arg5[%c0_18, %c0_19] : memref<2x5xf32, #tpu.memory_space<vmem>>, vector<2x5xf32>
    %20 = arith.truncf %19 : vector<2x5xf32> to vector<2x5xbf16>
    %c0_20 = arith.constant 0 : index
    %c0_21 = arith.constant 0 : index
    %21 = vector.load %arg10[%c0_20, %c0_21] : memref<5x128xbf16, #tpu.memory_space<vmem>>, vector<5x128xbf16>
    %cst_22 = arith.constant dense<0.000000e+00> : vector<2x128xf32>
    %22 = tpu.matmul %20, %21, %cst_22 {dimension_numbers = #tpu.dot_dimension_numbers<[1], [0], [0], [1], [0, 0, 1, 1], [], []>} : vector<2x5xbf16>, vector<5x128xbf16>, vector<2x128xf32> -> vector<2x128xf32>
    %23 = arith.addf %18, %22 : vector<2x128xf32>
    %c0_23 = arith.constant 0 : index
    %c0_24 = arith.constant 0 : index
    %24 = vector.load %arg11[%c0_23, %c0_24] : memref<1x128xf32, #tpu.memory_space<vmem>>, vector<1x128xf32>
    %25 = vector.broadcast %24 : vector<1x128xf32> to vector<2x128xf32>
    %26 = arith.addf %23, %25 : vector<2x128xf32>
    %cst_25 = arith.constant 0.000000e+00 : f32
    %27 = vector.broadcast %cst_25 : f32 to vector<2x128xf32>
    %28 = arith.maximumf %26, %27 : vector<2x128xf32>
    %29 = arith.truncf %28 : vector<2x128xf32> to vector<2x128xbf16>
    %c0_26 = arith.constant 0 : index
    %c0_27 = arith.constant 0 : index
    %30 = vector.load %arg12[%c0_26, %c0_27] : memref<128x128xbf16, #tpu.memory_space<vmem>>, vector<128x128xbf16>
    %cst_28 = arith.constant dense<0.000000e+00> : vector<2x128xf32>
    %31 = tpu.matmul %29, %30, %cst_28 {dimension_numbers = #tpu.dot_dimension_numbers<[1], [0], [0], [1], [0, 0, 1, 1], [], []>} : vector<2x128xbf16>, vector<128x128xbf16>, vector<2x128xf32> -> vector<2x128xf32>
    %c0_29 = arith.constant 0 : index
    %c0_30 = arith.constant 0 : index
    %32 = vector.load %arg13[%c0_29, %c0_30] : memref<1x128xf32, #tpu.memory_space<vmem>>, vector<1x128xf32>
    %33 = vector.broadcast %32 : vector<1x128xf32> to vector<2x128xf32>
    %34 = arith.addf %31, %33 : vector<2x128xf32>
    %cst_31 = arith.constant 0.000000e+00 : f32
    %35 = vector.broadcast %cst_31 : f32 to vector<2x128xf32>
    %36 = arith.maximumf %34, %35 : vector<2x128xf32>
    %37 = arith.truncf %36 : vector<2x128xf32> to vector<2x128xbf16>
    %c0_32 = arith.constant 0 : index
    %c0_33 = arith.constant 0 : index
    %38 = vector.load %arg14[%c0_32, %c0_33] : memref<128x128xbf16, #tpu.memory_space<vmem>>, vector<128x128xbf16>
    %cst_34 = arith.constant dense<0.000000e+00> : vector<2x128xf32>
    %39 = tpu.matmul %37, %38, %cst_34 {dimension_numbers = #tpu.dot_dimension_numbers<[1], [0], [0], [1], [0, 0, 1, 1], [], []>} : vector<2x128xbf16>, vector<128x128xbf16>, vector<2x128xf32> -> vector<2x128xf32>
    %c0_35 = arith.constant 0 : index
    %c0_36 = arith.constant 0 : index
    %40 = vector.load %arg15[%c0_35, %c0_36] : memref<1x128xf32, #tpu.memory_space<vmem>>, vector<1x128xf32>
    %41 = vector.broadcast %40 : vector<1x128xf32> to vector<2x128xf32>
    %42 = arith.addf %39, %41 : vector<2x128xf32>
    %c0_37 = arith.constant 0 : index
    %c0_38 = arith.constant 0 : index
    %43 = vector.load %arg16[%c0_37, %c0_38] : memref<2x128xf32, #tpu.memory_space<vmem>>, vector<2x128xf32>
    tpu.vector_store %arg16[%c0_37, %c0_38], %42 {strides = array<i32>} : memref<2x128xf32, #tpu.memory_space<vmem>>, vector<2x128xf32>,
    return
  }
  func.func @transform_0(%arg0: i32) -> (i32, i32) {
    %c0_i32 = arith.constant 0 : i32
    %c0_i32_0 = arith.constant 0 : i32
    %c0_i32_1 = arith.constant 0 : i32
    return %c0_i32, %c0_i32_0 : i32, i32
  }
  func.func @transform_1(%arg0: i32) -> (i32, i32) {
    %c0_i32 = arith.constant 0 : i32
    %c0_i32_0 = arith.constant 0 : i32
    %c0_i32_1 = arith.constant 0 : i32
    return %c0_i32, %c0_i32_0 : i32, i32
  }
  func.func @transform_2(%arg0: i32) -> (i32, i32) {
    %c0_i32 = arith.constant 0 : i32
    %c0_i32_0 = arith.constant 0 : i32
    %c0_i32_1 = arith.constant 0 : i32
    return %c0_i32, %c0_i32_0 : i32, i32
  }
  func.func @transform_3(%arg0: i32) -> (i32, i32) {
    %c0_i32 = arith.constant 0 : i32
    %c0_i32_0 = arith.constant 0 : i32
    %c0_i32_1 = arith.constant 0 : i32
    return %c0_i32, %c0_i32_0 : i32, i32
  }
  func.func @transform_4(%arg0: i32) -> (i32, i32) {
    %c0_i32 = arith.constant 0 : i32
    %c0_i32_0 = arith.constant 0 : i32
    %c0_i32_1 = arith.constant 0 : i32
    return %c0_i32, %c0_i32_0 : i32, i32
  }
  func.func @transform_5(%arg0: i32) -> (i32, i32) {
    %c0_i32 = arith.constant 0 : i32
    %c0_i32_0 = arith.constant 0 : i32
    %c0_i32_1 = arith.constant 0 : i32
    return %c0_i32, %c0_i32_0 : i32, i32
  }
  func.func @transform_6(%arg0: i32) -> (i32, i32) {
    %c0_i32 = arith.constant 0 : i32
    %c0_i32_0 = arith.constant 0 : i32
    %c0_i32_1 = arith.constant 0 : i32
    return %c0_i32, %c0_i32_0 : i32, i32
  }
  func.func @transform_7(%arg0: i32) -> (i32, i32) {
    %c0_i32 = arith.constant 0 : i32
    %c0_i32_0 = arith.constant 0 : i32
    %c0_i32_1 = arith.constant 0 : i32
    return %c0_i32, %c0_i32_0 : i32, i32
  }
  func.func @transform_8(%arg0: i32) -> (i32, i32) {
    %c0_i32 = arith.constant 0 : i32
    %c0_i32_0 = arith.constant 0 : i32
    %c0_i32_1 = arith.constant 0 : i32
    return %c0_i32, %c0_i32_0 : i32, i32
  }
  func.func @transform_9(%arg0: i32) -> (i32, i32) {
    %c0_i32 = arith.constant 0 : i32
    %c0_i32_0 = arith.constant 0 : i32
    %c0_i32_1 = arith.constant 0 : i32
    return %c0_i32, %c0_i32_0 : i32, i32
  }
  func.func @transform_10(%arg0: i32) -> (i32, i32) {
    %c0_i32 = arith.constant 0 : i32
    %c0_i32_0 = arith.constant 0 : i32
    %c0_i32_1 = arith.constant 0 : i32
    return %c0_i32, %c0_i32_0 : i32, i32
  }
  func.func @transform_11(%arg0: i32) -> (i32, i32) {
    %c0_i32 = arith.constant 0 : i32
    %c0_i32_0 = arith.constant 0 : i32
    %c0_i32_1 = arith.constant 0 : i32
    return %c0_i32, %c0_i32_0 : i32, i32
  }
  func.func @transform_12(%arg0: i32) -> (i32, i32) {
    %c0_i32 = arith.constant 0 : i32
    %c0_i32_0 = arith.constant 0 : i32
    %c0_i32_1 = arith.constant 0 : i32
    return %c0_i32, %c0_i32_0 : i32, i32
  }
  func.func @transform_13(%arg0: i32) -> (i32, i32) {
    %c0_i32 = arith.constant 0 : i32
    %c0_i32_0 = arith.constant 0 : i32
    %c0_i32_1 = arith.constant 0 : i32
    return %c0_i32, %c0_i32_0 : i32, i32
  }
  func.func @transform_14(%arg0: i32) -> (i32, i32) {
    %c0_i32 = arith.constant 0 : i32
    %c0_i32_0 = arith.constant 0 : i32
    %c0_i32_1 = arith.constant 0 : i32
    return %c0_i32, %c0_i32_0 : i32, i32
  }
  func.func @transform_15(%arg0: i32) -> (i32, i32) {
    %c0_i32 = arith.constant 0 : i32
    %c0_i32_0 = arith.constant 0 : i32
    %c0_i32_1 = arith.constant 0 : i32
    return %c0_i32, %c0_i32_0 : i32, i32
  }
}

</mosaic_0001>

<bundles_post_ra>
// kernel: small_bp_model_forward.1
= control target key start
LH: loop header
LB: loop body
LE: loop exit
PB: predicated region body
PF: predicated region fallthrough
CT: control target
= control target key end

     0   :  { %20 = vsyncpa [#allocation3], 0  ;;  %s5911_s0 = inlined_call_operand.hbm [shape: f32[2,1250], index: 0, kind: input, shape index: {}]   ;;  %s5912_s1 = inlined_call_operand.hbm [shape: f32[2,1250], index: 1, kind: input, shape index: {}]   ;;  %s5913_s2 = inlined_call_operand.hbm [shape: f32[2,1250], index: 2, kind: input, shape index: {}]   ;;  %s5914_s3 = inlined_call_operand.hbm [shape: f32[2,1250], index: 3, kind: input, shape index: {}]   ;;  %s5915_s4 = inlined_call_operand.vmem [shape: f32[2,5], index: 4, kind: input, shape index: {}]   ;;  %s5916_s5 = inlined_call_operand.hbm [shape: bf16[1250,128], index: 5, kind: input, shape index: {}]   ;;  %s5917_s6 = inlined_call_operand.hbm [shape: bf16[1250,128], index: 6, kind: input, shape index: {}]   ;;  %s5918_s7 = inlined_call_operand.hbm [shape: bf16[1250,128], index: 7, kind: input, shape index: {}]   ;;  %s5919_s8 = inlined_call_operand.hbm [shape: bf16[1250,128], index: 8, kind: input, shape index: {}]   ;;  %s5920_s9 = inlined_call_operand.vmem [shape: bf16[5,128], index: 9, kind: input, shape index: {}]   ;;  %s5921_s10 = inlined_call_operand.vmem [shape: f32[1,128], index: 10, kind: input, shape index: {}]   ;;  %s5922_s11 = inlined_call_operand.hbm [shape: bf16[128,128], index: 11, kind: input, shape index: {}]   ;;  %s5923_s12 = inlined_call_operand.vmem [shape: f32[1,128], index: 12, kind: input, shape index: {}]   ;;  %s5924_s13 = inlined_call_operand.hbm [shape: bf16[128,128], index: 13, kind: input, shape index: {}]   ;;  %s5925_s14 = inlined_call_operand.vmem [shape: f32[1,128], index: 14, kind: input, shape index: {}]   ;;  %s5926_s15 = inlined_call_operand.vmem [shape: f32[2,128], index: 15, kind: output, shape index: {}]  }
   0x1   :  { %21 = vsyncpa [#allocation5], 0 }
   0x2   :  { %22 = vsyncpa [#allocation8], 0 }
   0x3   :  { %23 = vsyncpa [#allocation11], 0 }
   0x4   :  { %24 = vsyncpa [#allocation14], 0 }
   0x5   :  { %25 = vsyncpa [#allocation17], 0  ;;  %s5442_s18 = smov [#allocation4]   ;;  %s5443_s20 = smov [#allocation7]  }
   0x6   :  { %s42_s19 = sshll.u32 %s5442_s18, 4  ;;  %s62_s21 = sshll.u32 %s5443_s20, 4  ;;  %s43_s19 = int_to_ptr.vmem [resolvable:$true] %s42_s19  ;;  %s63_s21 = int_to_ptr.vmem [resolvable:$true] %s62_s21 }
   0x7   :  { %s5210_s24 = scalar_lea.hbm %s5912_s1, 320 }
   0x8   :  { %p5211_p0 = scmp.ne.s32.totalorder %s5912_s1, %s5210_s24  ;;  %p5214_p1 = scmp.lt.u32.totalorder %s5210_s24, %s5912_s1 }
   0xa   :  { %p5216_p2 = pnand %p5214_p1, %p5211_p0 }
   0xc   :  { %5219 = shalt.err (!%p5216_p2)
}
   0xd   :  { %s5220_s29 = scalar_lea.vmem %s43_s19, 320  ;;  %p5225_p4 = scmp.lt.s32.totalorder %s43_s19, %s43_s19 }
   0xe   :  { %p5221_p3 = scmp.ne.s32.totalorder %s43_s19, %s5220_s29  ;;  %p5226_p5 = scmp.lt.s32.totalorder %s5220_s29, %s5220_s29 }
  0x10   :  { %p5227_p6 = por %p5226_p5, %p5225_p4 }
  0x12   :  { %p5228_p7 = pnand %p5227_p6, %p5221_p3 }
  0x14   :  { %5231 = shalt.err (!%p5228_p7)
}
  0x15   :  { %45 = dma.hbm_to_vmem [thread:$0]  %s5912_s1, 320, %s43_s19, [#allocation5]  }
  0x16   :  { %s5232_s20 = scalar_lea.hbm %s5914_s3, 320 }
  0x17   :  { %p5233_p8 = scmp.ne.s32.totalorder %s5914_s3, %s5232_s20  ;;  %p5236_p9 = scmp.lt.u32.totalorder %s5232_s20, %s5914_s3 }
  0x19   :  { %p5238_p10 = pnand %p5236_p9, %p5233_p8 }
  0x1b   :  { %5241 = shalt.err (!%p5238_p10)
}
  0x1c   :  { %s5242_s26 = scalar_lea.vmem %s63_s21, 320  ;;  %p5247_p12 = scmp.lt.s32.totalorder %s63_s21, %s63_s21 }
  0x1d   :  { %p5243_p11 = scmp.ne.s32.totalorder %s63_s21, %s5242_s26  ;;  %p5248_p13 = scmp.lt.s32.totalorder %s5242_s26, %s5242_s26 }
  0x1f   :  { %p5249_p0 = por %p5248_p13, %p5247_p12 }
  0x21   :  { %p5250_p1 = pnand %p5249_p0, %p5243_p11 }
  0x23   :  { %5253 = shalt.err (!%p5250_p1)
}
  0x24   :  { %65 = dma.hbm_to_vmem [thread:$0]  %s5914_s3, 320, %s63_s21, [#allocation8]  }
  0x25   :  { %s5444_s27 = smov [#allocation10]   ;;  %s5445_s29 = smov [#allocation13]  }
  0x26   :  { %s85_s28 = sshll.u32 %s5444_s27, 4  ;;  %s109_s30 = sshll.u32 %s5445_s29, 4  ;;  %s86_s28 = int_to_ptr.vmem [resolvable:$true] %s85_s28  ;;  %s5563_s30 = int_to_ptr.vmem [resolvable:$true] %s109_s30 }
  0x27   :  { %s5254_s18 = scalar_lea.hbm %s5917_s6, 10048 }
  0x28   :  { %p5255_p2 = scmp.ne.s32.totalorder %s5917_s6, %s5254_s18  ;;  %p5258_p3 = scmp.lt.u32.totalorder %s5254_s18, %s5917_s6 }
  0x2a   :  { %p5260_p4 = pnand %p5258_p3, %p5255_p2 }
  0x2c   :  { %5263 = shalt.err (!%p5260_p4)
}
  0x2d   :  { %s5264_s3 = scalar_lea.vmem %s86_s28, 10048  ;;  %p5269_p6 = scmp.lt.s32.totalorder %s86_s28, %s86_s28 }
  0x2e   :  { %p5265_p5 = scmp.ne.s32.totalorder %s86_s28, %s5264_s3  ;;  %p5270_p7 = scmp.lt.s32.totalorder %s5264_s3, %s5264_s3 }
  0x30   :  { %p5271_p8 = por %p5270_p7, %p5269_p6 }
  0x32   :  { %p5272_p9 = pnand %p5271_p8, %p5265_p5 }
  0x34   :  { %5275 = shalt.err (!%p5272_p9)
}
  0x35   :  { %s5446_s21 = smov 64   ;;  %s5447_s25 = smov 4  }
  0x36   :  { %91 = dma.hbm_to_vmem [thread:$0]  %s5917_s6, 10048, %s86_s28, [#allocation11], %s5446_s21, %s5446_s21, %s5447_s25  }
  0x37   :  { %s5276_s29 = scalar_lea.hbm %s5919_s8, 10048 }
  0x38   :  { %p5277_p10 = scmp.ne.s32.totalorder %s5919_s8, %s5276_s29  ;;  %p5280_p11 = scmp.lt.u32.totalorder %s5276_s29, %s5919_s8 }
  0x3a   :  { %p5282_p12 = pnand %p5280_p11, %p5277_p10 }
  0x3c   :  { %5285 = shalt.err (!%p5282_p12)
}
  0x3d   :  { %s5286_s22 = scalar_lea.vmem %s5563_s30, 10048  ;;  %p5291_p0 = scmp.lt.s32.totalorder %s5563_s30, %s5563_s30 }
  0x3e   :  { %p5287_p13 = scmp.ne.s32.totalorder %s5563_s30, %s5286_s22  ;;  %p5292_p1 = scmp.lt.s32.totalorder %s5286_s22, %s5286_s22 }
  0x40   :  { %p5293_p2 = por %p5292_p1, %p5291_p0 }
  0x42   :  { %p5294_p3 = pnand %p5293_p2, %p5287_p13 }
  0x44   :  { %5297 = shalt.err (!%p5294_p3)
}
  0x45   :  { %115 = dma.hbm_to_vmem [thread:$0]  %s5919_s8, 10048, %s5563_s30, [#allocation14], %s5446_s21, %s5446_s21, %s5447_s25  }
  0x46   :  { %s5448_s23 = smov [#allocation2]   ;;  %s5449_s3 = smov [#allocation6]  }
  0x47   :  { %s32_s24 = sshll.u32 %s5448_s23, 4  ;;  %s52_s26 = sshll.u32 %s5449_s3, 4  ;;  %s33_s24 = int_to_ptr.vmem [resolvable:$true] %s32_s24  ;;  %s53_s26 = int_to_ptr.vmem [resolvable:$true] %s52_s26 }
  0x48   :  { %s5298_s27 = scalar_lea.hbm %s5911_s0, 320 }
  0x49   :  { %p5299_p4 = scmp.ne.s32.totalorder %s5911_s0, %s5298_s27  ;;  %p5302_p5 = scmp.lt.u32.totalorder %s5298_s27, %s5911_s0 }
  0x4b   :  { %p5304_p6 = pnand %p5302_p5, %p5299_p4 }
  0x4d   :  { %5307 = shalt.err (!%p5304_p6)
}
  0x4e   :  { %s5308_s8 = scalar_lea.vmem %s33_s24, 320  ;;  %p5313_p8 = scmp.lt.s32.totalorder %s33_s24, %s33_s24 }
  0x4f   :  { %p5309_p7 = scmp.ne.s32.totalorder %s33_s24, %s5308_s8  ;;  %p5314_p9 = scmp.lt.s32.totalorder %s5308_s8, %s5308_s8 }
  0x51   :  { %p5315_p10 = por %p5314_p9, %p5313_p8 }
  0x53   :  { %p5316_p11 = pnand %p5315_p10, %p5309_p7 }
  0x55   :  { %5319 = shalt.err (!%p5316_p11)
}
  0x56   :  { %35 = dma.hbm_to_vmem [thread:$0]  %s5911_s0, 320, %s33_s24, [#allocation3]  }
  0x57   :  { %s5320_s28 = scalar_lea.hbm %s5913_s2, 320 }
  0x58   :  { %p5321_p12 = scmp.ne.s32.totalorder %s5913_s2, %s5320_s28  ;;  %p5324_p13 = scmp.lt.u32.totalorder %s5320_s28, %s5913_s2 }
  0x5a   :  { %p5326_p0 = pnand %p5324_p13, %p5321_p12 }
  0x5c   :  { %5329 = shalt.err (!%p5326_p0)
}
  0x5d   :  { %s5330_s27 = scalar_lea.vmem %s53_s26, 320  ;;  %p5335_p2 = scmp.lt.s32.totalorder %s53_s26, %s53_s26 }
  0x5e   :  { %p5331_p1 = scmp.ne.s32.totalorder %s53_s26, %s5330_s27  ;;  %p5336_p3 = scmp.lt.s32.totalorder %s5330_s27, %s5330_s27 }
  0x60   :  { %p5337_p4 = por %p5336_p3, %p5335_p2 }
  0x62   :  { %p5338_p5 = pnand %p5337_p4, %p5331_p1 }
  0x64   :  { %5341 = shalt.err (!%p5338_p5)
}
  0x65   :  { %55 = dma.hbm_to_vmem [thread:$0]  %s5913_s2, 320, %s53_s26, [#allocation5]  }
  0x66   :  { %s5450_s29 = smov [#allocation9]   ;;  %s5451_s17 = smov [#allocation12]  }
  0x67   :  { %s73_s16 = sshll.u32 %s5450_s29, 4  ;;  %s97_s18 = sshll.u32 %s5451_s17, 4  ;;  %s74_s16 = int_to_ptr.vmem [resolvable:$true] %s73_s16  ;;  %s5624_s18 = int_to_ptr.vmem [resolvable:$true] %s97_s18 }
  0x68   :  { %s5342_s20 = scalar_lea.hbm %s5916_s5, 10048 }
  0x69   :  { %p5343_p6 = scmp.ne.s32.totalorder %s5916_s5, %s5342_s20  ;;  %p5346_p7 = scmp.lt.u32.totalorder %s5342_s20, %s5916_s5 }
  0x6b   :  { %p5348_p8 = pnand %p5346_p7, %p5343_p6 }
  0x6d   :  { %5351 = shalt.err (!%p5348_p8)
}
  0x6e   :  { %s5352_s2 = scalar_lea.vmem %s74_s16, 10048  ;;  %p5357_p10 = scmp.lt.s32.totalorder %s74_s16, %s74_s16 }
  0x6f   :  { %p5353_p9 = scmp.ne.s32.totalorder %s74_s16, %s5352_s2  ;;  %p5358_p11 = scmp.lt.s32.totalorder %s5352_s2, %s5352_s2 }
  0x71   :  { %p5359_p12 = por %p5358_p11, %p5357_p10 }
  0x73   :  { %p5360_p13 = pnand %p5359_p12, %p5353_p9 }
  0x75   :  { %5363 = shalt.err (!%p5360_p13)
}
  0x76   :  { %79 = dma.hbm_to_vmem [thread:$0]  %s5916_s5, 10048, %s74_s16, [#allocation8], %s5446_s21, %s5446_s21, %s5447_s25  }
  0x77   :  { %s5364_s27 = scalar_lea.hbm %s5918_s7, 10048 }
  0x78   :  { %p5365_p0 = scmp.ne.s32.totalorder %s5918_s7, %s5364_s27  ;;  %p5368_p1 = scmp.lt.u32.totalorder %s5364_s27, %s5918_s7 }
  0x7a   :  { %p5370_p2 = pnand %p5368_p1, %p5365_p0 }
  0x7c   :  { %5373 = shalt.err (!%p5370_p2)
}
  0x7d   :  { %s5374_s8 = scalar_lea.vmem %s5624_s18, 10048  ;;  %p5379_p4 = scmp.lt.s32.totalorder %s5624_s18, %s5624_s18 }
  0x7e   :  { %p5375_p3 = scmp.ne.s32.totalorder %s5624_s18, %s5374_s8  ;;  %p5380_p5 = scmp.lt.s32.totalorder %s5374_s8, %s5374_s8 }
  0x80   :  { %p5381_p6 = por %p5380_p5, %p5379_p4 }
  0x82   :  { %p5382_p7 = pnand %p5381_p6, %p5375_p3 }
  0x84   :  { %5385 = shalt.err (!%p5382_p7)
}
  0x85   :  { %103 = dma.hbm_to_vmem [thread:$0]  %s5918_s7, 10048, %s5624_s18, [#allocation11], %s5446_s21, %s5446_s21, %s5447_s25  }
  0x86   :  { %s5452_s30 = smov [#allocation15]   ;;  %s5453_s22 = smov [#allocation16]  }
  0x87   :  { %s125_s20 = sshll.u32 %s5452_s30, 4  ;;  %s139_s6 = sshll.u32 %s5453_s22, 4  ;;  %s126_s20 = int_to_ptr.vmem [resolvable:$true] %s125_s20  ;;  %s5661_s6 = int_to_ptr.vmem [resolvable:$true] %s139_s6 }
  0x88   :  { %s5386_s2 = scalar_lea.hbm %s5922_s11, 1024 }
  0x89   :  { %p5387_p8 = scmp.ne.s32.totalorder %s5922_s11, %s5386_s2  ;;  %p5390_p9 = scmp.lt.u32.totalorder %s5386_s2, %s5922_s11 }
  0x8b   :  { %p5392_p10 = pnand %p5390_p9, %p5387_p8 }
  0x8d   :  { %5395 = shalt.err (!%p5392_p10)
}
  0x8e   :  { %s5396_s7 = scalar_lea.vmem %s126_s20, 1024  ;;  %p5401_p12 = scmp.lt.s32.totalorder %s126_s20, %s126_s20 }
  0x8f   :  { %p5397_p11 = scmp.ne.s32.totalorder %s126_s20, %s5396_s7  ;;  %p5402_p13 = scmp.lt.s32.totalorder %s5396_s7, %s5396_s7 }
  0x91   :  { %p5403_p0 = por %p5402_p13, %p5401_p12 }
  0x93   :  { %p5404_p1 = pnand %p5403_p0, %p5397_p11 }
  0x95   :  { %5407 = shalt.err (!%p5404_p1)
}
  0x96   :  { %131 = dma.hbm_to_vmem [thread:$0]  %s5922_s11, 1024, %s126_s20, [#allocation14], %s5446_s21, %s5446_s21, %s5447_s25  }
  0x97   :  { %s5408_s29 = scalar_lea.hbm %s5924_s13, 1024 }
  0x98   :  { %p5409_p2 = scmp.ne.s32.totalorder %s5924_s13, %s5408_s29  ;;  %p5412_p3 = scmp.lt.u32.totalorder %s5408_s29, %s5924_s13 }
  0x9a   :  { %p5414_p4 = pnand %p5412_p3, %p5409_p2 }
  0x9c   :  { %5417 = shalt.err (!%p5414_p4)
}
  0x9d   :  { %s5418_s30 = scalar_lea.vmem %s5661_s6, 1024  ;;  %p5423_p6 = scmp.lt.s32.totalorder %s5661_s6, %s5661_s6 }
  0x9e   :  { %p5419_p5 = scmp.ne.s32.totalorder %s5661_s6, %s5418_s30  ;;  %p5424_p7 = scmp.lt.s32.totalorder %s5418_s30, %s5418_s30 }
  0xa0   :  { %p5425_p8 = por %p5424_p7, %p5423_p6 }
  0xa2   :  { %p5426_p9 = pnand %p5425_p8, %p5419_p5 }
  0xa4   :  { %5429 = shalt.err (!%p5426_p9)
}
  0xa5   :  { %145 = dma.hbm_to_vmem [thread:$0]  %s5924_s13, 1024, %s5661_s6, [#allocation17], %s5446_s21, %s5446_s21, %s5447_s25  }
  0xa6   :  { %5430 = dma.done.wait [#allocation3], 320  }
  0xa7   :  { %5431 = vsyncadd [#allocation3], 4294966976 }
  0xa8   :  { %5432 = dma.done.wait [#allocation5], 640  }
  0xa9   :  { %5433 = vsyncadd [#allocation5], 4294966656 }
  0xaa   :  { %5434 = dma.done.wait [#allocation8], 10368  }
  0xab   :  { %5435 = vsyncadd [#allocation8], 4294956928 }
  0xac   :  { %5436 = dma.done.wait [#allocation11], 20096  }
  0xad   :  { %5437 = vsyncadd [#allocation11], 4294947200 }
  0xae   :  { %5438 = dma.done.wait [#allocation14], 11072  }
  0xaf   :  { %5439 = vsyncadd [#allocation14], 4294956224 }
  0xb0   :  { %5440 = dma.done.wait [#allocation17], 1024  }
  0xb1   :  { %5441 = vsyncadd [#allocation17], 4294966272  ;;  %v4870_v0 = vld [vmem:[#allocation10 + $0x40] sm:$0xff]   ;;  %v4874_v4 = vld [vmem:[#allocation10 + $0x48] sm:$0xff]   ;;  %v5454_v22 = vmov 1983009808   ;;  %v189_v24 = vlaneseq }
  0xb2   :  { %v4871_v1 = vld [vmem:[#allocation10 + $0xc0] sm:$0xff]   ;;  %4435 = vmatprep.subr.bf16.mxu0 %v4870_v0  ;;  %v4875_v5 = vld [vmem:[#allocation10 + $0xc8] sm:$0xff]   ;;  %v4878_v8 = vld [vmem:[#allocation10 + $0x50] sm:$0xff]   ;;  %v187_v23 = vunpack.c.l.s4 %v5454_v22  ;;  %vm1100_vm0 = vcmask 801792   ;;  %vm1104_vm1 = vcmask 1040384   ;;  %vm5457_vm2 = vmmov 0  }
  0xb3   :  { %v4872_v2 = vld [vmem:[#allocation10] sm:$0xff]   ;;  %4457 = vmatprep.subr.bf16.mxu1 %v4871_v1  ;;  %v4876_v6 = vld [vmem:[#allocation10 + $0x8] sm:$0xff]   ;;  %v4879_v9 = vld [vmem:[#allocation10 + $0xd0] sm:$0xff]   ;;  %v190_v30 = vshrl.u32 %v189_v24, 7  ;;  %vm3798_vm3 = vcmask 1041408   ;;  %vm3799_vm4 = vcmask 1042432  }
  0xb4   :  { %v4873_v3 = vld [vmem:[#allocation10 + $0x80] sm:$0xff]   ;;  %4436 = vmatpush3.bf16.msra.mxu0 %v4872_v2  ;;  %v4877_v7 = vld [vmem:[#allocation10 + $0x88] sm:$0xff]   ;;  %v4880_v10 = vld [vmem:[#allocation10 + $0x10] sm:$0xff]   ;;  %v188_v29 = vunpack.c.0.s8 %v187_v23  ;;  %vm3794_vm5 = vcmask 39936  }
  0xb5   :  { %4458 = vmatpush3.bf16.msra.mxu1 %v4873_v3  ;;  %4437 = vmatprep.subr.bf16.mxu0 %v4874_v4  ;;  %v4881_v11 = vld [vmem:[#allocation10 + $0x90] sm:$0xff]   ;;  %v4882_v12 = vld [vmem:[#allocation10 + $0x58] sm:$0xff]   ;;  %v4886_v16 = vld [vmem:[#allocation10 + $0x60] sm:$0xff]  }
  0xb6   :  { %4459 = vmatprep.subr.bf16.mxu1 %v4875_v5  ;;  %v4883_v13 = vld [vmem:[#allocation10 + $0xd8] sm:$0xff]   ;;  %v4887_v17 = vld [vmem:[#allocation10 + $0xe0] sm:$0xff]   ;;  %v4890_v20 = vld [vmem:[#allocation10 + $0x68] sm:$0xff]   ;;  %v5698_v35 = vsub.s32 %v188_v29, %v190_v30 }
  0xb7   :  { %v4884_v14 = vld [vmem:[#allocation10 + $0x18] sm:$0xff]   ;;  %v4888_v18 = vld [vmem:[#allocation10 + $0x20] sm:$0xff]   ;;  %v4891_v21 = vld [vmem:[#allocation10 + $0xe8] sm:$0xff]  }
  0xb8   :  { %4438 = vmatpush3.bf16.msra.mxu0 %v4876_v6  ;;  %v4885_v15 = vld [vmem:[#allocation10 + $0x98] sm:$0xff]   ;;  %v4889_v19 = vld [vmem:[#allocation10 + $0xa0] sm:$0xff]   ;;  %v4892_v25 = vld [vmem:[#allocation10 + $0x28] sm:$0xff]  }
  0xb9   :  { %4460 = vmatpush3.bf16.msra.mxu1 %v4877_v7  ;;  %4439 = vmatprep.subr.bf16.mxu0 %v4878_v8  ;;  %v4893_v26 = vld [vmem:[#allocation10 + $0xa8] sm:$0xff]   ;;  %v4894_v27 = vld [vmem:[#allocation10 + $0x70] sm:$0xff]   ;;  %v4898_v33 = vld [vmem:[#allocation10 + $0x78] sm:$0xff]  }
  0xba   :  { %4461 = vmatprep.subr.bf16.mxu1 %v4879_v9  ;;  %v4895_v28 = vld [vmem:[#allocation10 + $0xf0] sm:$0xff]   ;;  %v4899_v34 = vld [vmem:[#allocation10 + $0xf8] sm:$0xff]   ;;  %v4903_v41 = vld [vmem:[#allocation10 + $0x140] sm:$0xff]  }
  0xbb   :  { %v4896_v31 = vld [vmem:[#allocation10 + $0x30] sm:$0xff]   ;;  %v4900_v36 = vld [vmem:[#allocation10 + $0x38] sm:$0xff]   ;;  %v4904_v42 = vld [vmem:[#allocation10 + $0x1c0] sm:$0xff]  }
  0xbc   :  { %4440 = vmatpush3.bf16.msra.mxu0 %v4880_v10  ;;  %v4897_v32 = vld [vmem:[#allocation10 + $0xb0] sm:$0xff]   ;;  %v4901_v37 = vld [vmem:[#allocation10 + $0xb8] sm:$0xff]   ;;  %v4905_v48 = vld [vmem:[#allocation10 + $0x100] sm:$0xff]  }
  0xbd   :  { %4462 = vmatpush3.bf16.msra.mxu1 %v4881_v11  ;;  %4441 = vmatprep.subr.bf16.mxu0 %v4882_v12  ;;  %v404_v38 = vld [vmem:[#allocation4] sm:$0xff]  ;;  %v4907_v50 = vld [vmem:[#allocation10 + $0x148] sm:$0xff]   ;;  %v4906_v52 = vld [vmem:[#allocation10 + $0x180] sm:$0xff]  }
  0xbe   :  { %4463 = vmatprep.subr.bf16.mxu1 %v4883_v13  ;;  %v417_v39 = vrot.slane %v404_v38, %v5698_v35  ;;  %v410_v40 = vcombine.high %v404_v38, %v404_v38  ;;  %v4908_v53 = vld [vmem:[#allocation10 + $0x1c8] sm:$0xff]   ;;  %v4911_v55 = vld [vmem:[#allocation10 + $0x150] sm:$0xff]   ;;  %v4915_v59 = vld [vmem:[#allocation10 + $0x158] sm:$0xff]  }
  0xbf   :  { %v4909_v54 = vld [vmem:[#allocation10 + $0x108] sm:$0xff]   ;;  %v4912_v57 = vld [vmem:[#allocation10 + $0x1d0] sm:$0xff]   ;;  %v4916_v61 = vld [vmem:[#allocation10 + $0x1d8] sm:$0xff]  }
  0xc0   :  { %4442 = vmatpush3.bf16.msra.mxu0 %v4884_v14  ;;  %v425_v43 = vcombine.high %v417_v39, %v417_v39  ;;  %v424_v44 = vrot.slane %v410_v40, %v5698_v35  ;;  %v462_v45 = vpack.c.bf16 %v417_v39, %v417_v39  ;;  %v4910_v56 = vld [vmem:[#allocation10 + $0x188] sm:$0xff]   ;;  %v4913_v58 = vld [vmem:[#allocation10 + $0x110] sm:$0xff]   ;;  %v4917_v62 = vld [vmem:[#allocation10 + $0x118] sm:$0xff]  }
  0xc1   :  { %4464 = vmatpush3.bf16.msra.mxu1 %v4885_v15  ;;  %4443 = vmatprep.subr.bf16.mxu0 %v4886_v16  ;;  %v4914_v60 = vld [vmem:[#allocation10 + $0x190] sm:$0xff]   ;;  %v4919_v63 = vld [vmem:[#allocation10 + $0x160] sm:$0xff]   ;;  %v4918_v0 = vld [vmem:[#allocation10 + $0x198] sm:$0xff]  }
  0xc2   :  { %4465 = vmatprep.subr.bf16.mxu1 %v4887_v17  ;;  %v463_v46 = vpack.c.bf16 %v425_v43, %v425_v43  ;;  %v426_v47 = vcombine.high %v424_v44, %v424_v44  ;;  %v464_v49 = vpack.c.bf16 %v424_v44, %v424_v44  ;;  %v4920_v1 = vld [vmem:[#allocation10 + $0x1e0] sm:$0xff]   ;;  %v4923_v3 = vld [vmem:[#allocation10 + $0x168] sm:$0xff]   ;;  %v4927_v7 = vld [vmem:[#allocation10 + $0x170] sm:$0xff]  }
  0xc3   :  { %v4921_v2 = vld [vmem:[#allocation10 + $0x120] sm:$0xff]   ;;  %v4924_v5 = vld [vmem:[#allocation10 + $0x1e8] sm:$0xff]   ;;  %v4928_v9 = vld [vmem:[#allocation10 + $0x1f0] sm:$0xff]  }
  0xc4   :  { %4444 = vmatpush3.bf16.msra.mxu0 %v4888_v18  ;;  %1140 = vmatprep.mubr.bf16.mxu0 %v463_v46  ;;  %v465_v51 = vpack.c.bf16 %v426_v47, %v426_v47  ;;  %v4922_v4 = vld [vmem:[#allocation10 + $0x1a0] sm:$0xff]   ;;  %v4925_v6 = vld [vmem:[#allocation10 + $0x128] sm:$0xff]   ;;  %v4929_v10 = vld [vmem:[#allocation10 + $0x130] sm:$0xff]  }
  0xc5   :  { %4466 = vmatpush3.bf16.msra.mxu1 %v4889_v19  ;;  %4445 = vmatprep.subr.bf16.mxu0 %v4890_v20  ;;  %v4926_v8 = vld [vmem:[#allocation10 + $0x1a8] sm:$0xff]   ;;  %v4931_v11 = vld [vmem:[#allocation10 + $0x178] sm:$0xff]   ;;  %v4930_v12 = vld [vmem:[#allocation10 + $0x1b0] sm:$0xff]  }
  0xc6   :  { %4467 = vmatprep.subr.bf16.mxu1 %v4891_v21  ;;  %1180 = vmatprep.mubr.bf16.mxu1 %v465_v51  ;;  %v4932_v13 = vld [vmem:[#allocation10 + $0x1f8] sm:$0xff]   ;;  %v4936_v22 = vld [vmem:[#allocation9 + $0x40] sm:$0xff]   ;;  %v4947_v39 = vld [vmem:[#allocation9 + $0x18] sm:$0xff]  }
  0xc7   :  { %v405_v14 = vld [vmem:[#allocation4 + $0x8] sm:$0xff]  ;;  %v4938_v29 = vld [vmem:[#allocation9] sm:$0xff]  }
  0xc8   :  { %4446 = vmatpush3.bf16.msra.mxu0 %v4892_v25  ;;  %v4933_v15 = vld [vmem:[#allocation10 + $0x138] sm:$0xff]   ;;  %v434_v16 = vrot.slane %v405_v14, %v5698_v35  ;;  %v427_v17 = vcombine.high %v405_v14, %v405_v14  ;;  %v4937_v25 = vld [vmem:[#allocation10 + $0x200] sm:$0xff]   ;;  %v4948_v40 = vld [vmem:[#allocation9 + $0x60] sm:$0xff]  }
  0xc9   :  { %4468 = vmatpush3.bf16.msra.mxu1 %v4893_v26  ;;  %4447 = vmatprep.subr.bf16.mxu0 %v4894_v27  ;;  %v4934_v18 = vld [vmem:[#allocation10 + $0x1b8] sm:$0xff]   ;;  %v5455_v26 = vmov 0   ;;  %v4955_v51 = vld [vmem:[#allocation10 + $0x230] sm:$0xff]  }
  0xca   :  { %4469 = vmatprep.subr.bf16.mxu1 %v4895_v28  ;;  %v442_v19 = vcombine.high %v434_v16, %v434_v16  ;;  %v441_v20 = vrot.slane %v427_v17, %v5698_v35  ;;  %v466_v21 = vpack.c.bf16 %v434_v16, %v434_v16  ;;  %v4939_v30 = vld [vmem:[#allocation9 + $0x48] sm:$0xff]   ;;  %v179_v44 = vld [vmem:[#allocation2] sm:$0xff]  ;;  %v4974_v14 = vld [vmem:[#allocation9 + $0xa0] sm:$0xff]  }
  0xcb   :  { %v4946_v38 = vld [vmem:[#allocation10 + $0x218] sm:$0xff]   ;;  %v192_v46 = vrot.slane %v179_v44, %v5698_v35  ;;  %v4979_v16 = vld [vmem:[#allocation10 + $0x270] ss:$0 sps:$4 sm:$0x11]   ;;  %v4976_v17 = vld [vmem:[#allocation10 + $0x268] sm:$0xff]  }
  0xcc   :  { %4448 = vmatpush3.bf16.msra.mxu0 %v4896_v31  ;;  %v467_v23 = vpack.c.bf16 %v442_v19, %v442_v19  ;;  %v443_v24 = vcombine.high %v441_v20, %v441_v20  ;;  %v468_v27 = vpack.c.bf16 %v441_v20, %v441_v20  ;;  %v4940_v31 = vld [vmem:[#allocation10 + $0x208] sm:$0xff]   ;;  %v4951_v43 = vld [vmem:[#allocation9 + $0x68] sm:$0xff]   ;;  %v4978_v19 = vld [vmem:[#allocation9 + $0xf0] sm:$0xff]   ;;  %v1106_v20 = vsel %vm1104_vm1, %v4979_v16, 0 }
  0xcd   :  { %4470 = vmatpush3.bf16.msra.mxu1 %v4897_v32  ;;  %4449 = vmatprep.subr.bf16.mxu0 %v4898_v33  ;;  %v4941_v32 = vld [vmem:[#allocation9 + $0x8] sm:$0xff]   ;;  %v4942_v33 = vld [vmem:[#allocation9 + $0x50] sm:$0xff]  }
  0xce   :  { %4471 = vmatprep.subr.bf16.mxu1 %v4899_v34  ;;  %v469_v28 = vpack.c.bf16 %v443_v24, %v443_v24  ;;  %v4943_v34 = vld [vmem:[#allocation10 + $0x210] sm:$0xff]   ;;  %v4981_v24 = vld [vmem:[#allocation9 + $0xf8] sm:$0xff]  }
  0xcf   :  { %v4953_v47 = vld [vmem:[#allocation9 + $0x28] sm:$0xff]  }
  0xd0   :  { %4450 = vmatpush3.bf16.msra.mxu0 %v4900_v36  ;;  %v4944_v36 = vld [vmem:[#allocation9 + $0x10] sm:$0xff]  }
  0xd1   :  { %4472 = vmatpush3.bf16.msra.mxu1 %v4901_v37  ;;  %4479 = vmatprep.subr.bf16.mxu0 %v4903_v41  ;;  %v4945_v37 = vld [vmem:[#allocation9 + $0x58] sm:$0xff]  }
  0xd2   :  { %4501 = vmatprep.subr.bf16.mxu1 %v4904_v42  ;;  %v4949_v41 = vld [vmem:[#allocation10 + $0x220] sm:$0xff]   ;;  %v4950_v42 = vld [vmem:[#allocation9 + $0x20] sm:$0xff]  }
  0xd3   :  { %1141 = vmatmul.mubr.bf16.vlgmr.msra.gmra.mrb[0].mxu0 %v462_v45  ;;  %v4952_v45 = vld [vmem:[#allocation10 + $0x228] sm:$0xff]  }
  0xd4   :  { %4480 = vmatpush3.bf16.msra.mxu0 %v4905_v48  ;;  %1181 = vmatmul.mubr.bf16.vlgmr.msra.gmra.mrb[0].mxu1 %v464_v49  ;;  %v200_v48 = vcombine.high %v192_v46, %v192_v46  ;;  %v185_v49 = vcombine.high %v179_v44, %v179_v44 }
  0xd5   :  { %4481 = vmatprep.subr.bf16.mxu0 %v4907_v50  ;;  %4502 = vmatpush3.bf16.msra.mxu1 %v4906_v52  ;;  %v4954_v50 = vld [vmem:[#allocation9 + $0x70] sm:$0xff]  }
  0xd6   :  { %4503 = vmatprep.subr.bf16.mxu1 %v4908_v53  ;;  %1220 = vmatprep.mubr.bf16.mxu0 %v467_v23  ;;  %v238_v52 = vpack.c.bf16 %v200_v48, %v200_v48  ;;  %v4956_v53 = vld [vmem:[#allocation9 + $0x30] sm:$0xff]  }
  0xd7   :  { %1260 = vmatprep.mubr.bf16.mxu1 %v469_v28  ;;  %v4983_v28 = vld [vmem:[#allocation9 + $0xb8] sm:$0xff]  }
  0xd8   :  { %4482 = vmatpush3.bf16.msra.mxu0 %v4909_v54  ;;  %v5713_v54 = vrot.slane %v185_v49, %v5698_v35 }
  0xd9   :  { %4483 = vmatprep.subr.bf16.mxu0 %v4911_v55  ;;  %4504 = vmatpush3.bf16.msra.mxu1 %v4910_v56  ;;  %v4957_v55 = vld [vmem:[#allocation9 + $0x78] sm:$0xff]   ;;  %v4958_v56 = vld [vmem:[#allocation10 + $0x238] sm:$0xff]  }
  0xda   :  { %4505 = vmatprep.subr.bf16.mxu1 %v4912_v57  ;;  %v4959_v57 = vld [vmem:[#allocation9 + $0x38] sm:$0xff]  }
  0xdc   :  { %4484 = vmatpush3.bf16.msra.mxu0 %v4913_v58  ;;  %v201_v58 = vcombine.high %v5713_v54, %v5713_v54 }
  0xdd   :  { %4485 = vmatprep.subr.bf16.mxu0 %v4915_v59  ;;  %4506 = vmatpush3.bf16.msra.mxu1 %v4914_v60  ;;  %v4960_v59 = vld [vmem:[#allocation9 + $0xc0] sm:$0xff]   ;;  %v4961_v60 = vld [vmem:[#allocation10 + $0x240] sm:$0xff]  }
  0xde   :  { %4507 = vmatprep.subr.bf16.mxu1 %v4916_v61  ;;  %v237_v61 = vpack.c.bf16 %v192_v46, %v192_v46  ;;  %v4999_v46 = vld [vmem:[#allocation9 + $0x1d8] sm:$0xff]  }
  0xe0   :  { %4486 = vmatpush3.bf16.msra.mxu0 %v4917_v62  ;;  %v4962_v62 = vld [vmem:[#allocation9 + $0x80] sm:$0xff]  }
  0xe1   :  { %4487 = vmatprep.subr.bf16.mxu0 %v4919_v63  ;;  %4508 = vmatpush3.bf16.msra.mxu1 %v4918_v0  ;;  %v240_v63 = vpack.c.bf16 %v201_v58, %v201_v58  ;;  %v4963_v0 = vld [vmem:[#allocation9 + $0xc8] sm:$0xff]   ;;  %v5005_v58 = vld [vmem:[#allocation9 + $0x1a0] sm:$0xff]  }
  0xe2   :  { %4509 = vmatprep.subr.bf16.mxu1 %v4920_v1  ;;  %v4964_v1 = vld [vmem:[#allocation10 + $0x248] sm:$0xff]  }
  0xe4   :  { %4488 = vmatpush3.bf16.msra.mxu0 %v4921_v2  ;;  %v4965_v2 = vld [vmem:[#allocation9 + $0x88] sm:$0xff]  }
  0xe5   :  { %4489 = vmatprep.subr.bf16.mxu0 %v4923_v3  ;;  %4510 = vmatpush3.bf16.msra.mxu1 %v4922_v4  ;;  %v4966_v3 = vld [vmem:[#allocation9 + $0xd0] sm:$0xff]   ;;  %v4967_v4 = vld [vmem:[#allocation10 + $0x250] sm:$0xff]  }
  0xe6   :  { %4511 = vmatprep.subr.bf16.mxu1 %v4924_v5  ;;  %v4968_v5 = vld [vmem:[#allocation9 + $0x90] sm:$0xff]  }
  0xe8   :  { %4490 = vmatpush3.bf16.msra.mxu0 %v4925_v6  ;;  %v4092_v6 = vld.sshfl [vmem:[#allocation4 + $0x10] sm:$0x33 pattern:$0x76325410] }
  0xe9   :  { %4491 = vmatprep.subr.bf16.mxu0 %v4927_v7  ;;  %4512 = vmatpush3.bf16.msra.mxu1 %v4926_v8  ;;  %v451_v7 = vcombine.high %v4092_v6, %v4092_v6  ;;  %v4969_v8 = vld [vmem:[#allocation9 + $0xd8] sm:$0xff]   ;;  %v470_v23 = vpack.c.bf16 %v4092_v6, %v4092_v6  ;;  %v5018_v6 = vld [vmem:[#allocation12 + $0x40] sm:$0xff]  }
  0xea   :  { %4513 = vmatprep.subr.bf16.mxu1 %v4928_v9  ;;  %v4970_v9 = vld [vmem:[#allocation10 + $0x258] sm:$0xff]  }
  0xec   :  { %4492 = vmatpush3.bf16.msra.mxu0 %v4929_v10  ;;  %v471_v10 = vpack.c.bf16 %v451_v7, %v451_v7  ;;  %v5019_v7 = vld [vmem:[#allocation9 + $0x208] sm:$0xff]  }
  0xed   :  { %4493 = vmatprep.subr.bf16.mxu0 %v4931_v11  ;;  %4514 = vmatpush3.bf16.msra.mxu1 %v4930_v12  ;;  %v4971_v11 = vld [vmem:[#allocation9 + $0x98] sm:$0xff]   ;;  %v4972_v12 = vld [vmem:[#allocation9 + $0xe0] sm:$0xff]  }
  0xee   :  { %4515 = vmatprep.subr.bf16.mxu1 %v4932_v13  ;;  %v4973_v13 = vld [vmem:[#allocation10 + $0x260] sm:$0xff]  }
  0xf0   :  { %4494 = vmatpush3.bf16.msra.mxu0 %v4933_v15  ;;  %v4975_v15 = vld [vmem:[#allocation9 + $0xe8] sm:$0xff]  }
  0xf1   :  { %1268 = vmatprep.subr.bf16.mxu0 %v5455_v26  ;;  %4516 = vmatpush3.bf16.msra.mxu1 %v4934_v18  ;;  %v4977_v18 = vld [vmem:[#allocation9 + $0xa8] sm:$0xff]  }
  0xf2   :  { %4523 = vmatprep.subr.bf16.mxu1 %v4936_v22  ;;  %v4980_v22 = vld [vmem:[#allocation9 + $0xb0] sm:$0xff]  }
  0xf3   :  { %1221 = vmatmul.mubr.bf16.vlgmr.msra.gmra.mrb[4].mxu0 %v466_v21  ;;  %v4982_v21 = vld [vmem:[#allocation9 + $0x140] sm:$0xff]  }
  0xf4   :  { %1269 = vmatpush1.bf16.msra.mxu0 %v4937_v25  ;;  %1261 = vmatmul.mubr.bf16.vlgmr.msra.gmra.mrb[4].mxu1 %v468_v27  ;;  %v4984_v25 = vld [vmem:[#allocation9 + $0x100] sm:$0xff]   ;;  %v4986_v27 = vld [vmem:[#allocation9 + $0x148] sm:$0xff]  }
  0xf5   :  { %1270 = vmatprep.subr.bf16.mxu0 %v5455_v26  ;;  %4524 = vmatpush3.bf16.msra.mxu1 %v4938_v29  ;;  %v4987_v29 = vld [vmem:[#allocation9 + $0x1c0] sm:$0xff]  }
  0xf6   :  { %4525 = vmatprep.subr.bf16.mxu1 %v4939_v30  ;;  %1817 = vmatprep.mubr.bf16.mxu1 %v238_v52  ;;  %v4988_v30 = vld [vmem:[#allocation9 + $0x108] sm:$0xff]  }
  0xf7   :  { %4172 = vmatprep.mubr.msk.bf16.mxu0 %vm1100_vm0, %v471_v10  ;;  %v5021_v10 = vld [vmem:[#allocation12 + $0x48] sm:$0xff]  }
  0xf8   :  { %1271 = vmatpush1.bf16.msra.mxu0 %v4940_v31  ;;  %v239_v31 = vpack.c.bf16 %v5713_v54, %v5713_v54  ;;  %v5003_v54 = vld [vmem:[#allocation9 + $0x1e0] sm:$0xff]  }
  0xf9   :  { %1272 = vmatprep.subr.bf16.mxu0 %v5455_v26  ;;  %4526 = vmatpush3.bf16.msra.mxu1 %v4941_v32  ;;  %v4990_v32 = vld [vmem:[#allocation9 + $0x150] sm:$0xff]  }
  0xfa   :  { %4527 = vmatprep.subr.bf16.mxu1 %v4942_v33  ;;  %v4989_v33 = vld [vmem:[#allocation9 + $0x180] sm:$0xff]  }
  0xfc   :  { %1273 = vmatpush1.bf16.msra.mxu0 %v4943_v34  ;;  %v4991_v34 = vld [vmem:[#allocation9 + $0x1c8] sm:$0xff]  }
  0xfd   :  { %1274 = vmatprep.subr.bf16.mxu0 %v5455_v26  ;;  %4528 = vmatpush3.bf16.msra.mxu1 %v4944_v36  ;;  %v4992_v36 = vld [vmem:[#allocation9 + $0x110] sm:$0xff]  }
  0xfe   :  { %4529 = vmatprep.subr.bf16.mxu1 %v4945_v37  ;;  %v4994_v37 = vld [vmem:[#allocation9 + $0x158] sm:$0xff]  }
 0x100   :  { %1275 = vmatpush1.bf16.msra.mxu0 %v4946_v38  ;;  %v4993_v38 = vld [vmem:[#allocation9 + $0x188] sm:$0xff]  }
 0x101   :  { %1276 = vmatprep.subr.bf16.mxu0 %v5455_v26  ;;  %4530 = vmatpush3.bf16.msra.mxu1 %v4947_v39  ;;  %v4995_v39 = vld [vmem:[#allocation9 + $0x1d0] sm:$0xff]  }
 0x102   :  { %4531 = vmatprep.subr.bf16.mxu1 %v4948_v40  ;;  %v4996_v40 = vld [vmem:[#allocation9 + $0x118] sm:$0xff]  }
 0x104   :  { %1277 = vmatpush1.bf16.msra.mxu0 %v4949_v41  ;;  %v4998_v41 = vld [vmem:[#allocation9 + $0x160] sm:$0xff]  }
 0x105   :  { %1278 = vmatprep.subr.bf16.mxu0 %v5455_v26  ;;  %4532 = vmatpush3.bf16.msra.mxu1 %v4950_v42  ;;  %v180_v42 = vld [vmem:[#allocation2 + $0x8] sm:$0xff] }
 0x106   :  { %4533 = vmatprep.subr.bf16.mxu1 %v4951_v43  ;;  %v4997_v43 = vld [vmem:[#allocation9 + $0x190] sm:$0xff]   ;;  %v209_v44 = vrot.slane %v180_v42, %v5698_v35 }
 0x108   :  { %1279 = vmatpush1.bf16.msra.mxu0 %v4952_v45  ;;  %v202_v45 = vcombine.high %v180_v42, %v180_v42  ;;  %v217_v48 = vcombine.high %v209_v44, %v209_v44 }
 0x109   :  { %1280 = vmatprep.subr.bf16.mxu0 %v5455_v26  ;;  %4534 = vmatpush3.bf16.msra.mxu1 %v4953_v47  ;;  %v5000_v47 = vld [vmem:[#allocation9 + $0x120] sm:$0xff]  }
 0x10a   :  { %4535 = vmatprep.subr.bf16.mxu1 %v4954_v50  ;;  %v216_v49 = vrot.slane %v202_v45, %v5698_v35  ;;  %v5002_v50 = vld [vmem:[#allocation9 + $0x168] sm:$0xff]   ;;  %v242_v52 = vpack.c.bf16 %v217_v48, %v217_v48  ;;  %v5045_v48 = vld [vmem:[#allocation12 + $0xc8] sm:$0xff]  }
 0x10c   :  { %1281 = vmatpush1.bf16.msra.mxu0 %v4955_v51  ;;  %v5001_v51 = vld [vmem:[#allocation9 + $0x198] sm:$0xff]  }
 0x10d   :  { %1282 = vmatprep.subr.bf16.mxu0 %v5455_v26  ;;  %4536 = vmatpush3.bf16.msra.mxu1 %v4956_v53  ;;  %v218_v53 = vcombine.high %v216_v49, %v216_v49 }
 0x10e   :  { %4537 = vmatprep.subr.bf16.mxu1 %v4957_v55  ;;  %v5004_v55 = vld [vmem:[#allocation9 + $0x128] sm:$0xff]  }
 0x110   :  { %1283 = vmatpush1.bf16.msra.mxu0 %v4958_v56  ;;  %v244_v56 = vpack.c.bf16 %v218_v53, %v218_v53  ;;  %v5050_v53 = vld [vmem:[#allocation12 + $0x90] sm:$0xff]  }
 0x111   :  { %1284 = vmatprep.subr.bf16.mxu0 %v5455_v26  ;;  %4538 = vmatpush3.bf16.msra.mxu1 %v4959_v57  ;;  %v5006_v57 = vld [vmem:[#allocation9 + $0x170] sm:$0xff]  }
 0x112   :  { %4545 = vmatprep.subr.bf16.mxu1 %v4960_v59  ;;  %v5007_v59 = vld [vmem:[#allocation9 + $0x1e8] sm:$0xff]  }
 0x114   :  { %1285 = vmatpush1.bf16.msra.mxu0 %v4961_v60  ;;  %1818 = vmatmul.mubr.bf16.vlgmr.msra.gmra.mrb[8].mxu1 %v237_v61  ;;  %v5008_v60 = vld [vmem:[#allocation9 + $0x130] sm:$0xff]   ;;  %v5010_v61 = vld [vmem:[#allocation9 + $0x178] sm:$0xff]  }
 0x115   :  { %1286 = vmatprep.subr.bf16.mxu0 %v5455_v26  ;;  %4546 = vmatpush3.bf16.msra.mxu1 %v4962_v62  ;;  %v5009_v62 = vld [vmem:[#allocation9 + $0x1a8] sm:$0xff]  }
 0x116   :  { %1857 = vmatprep.mubr.bf16.mxu1 %v240_v63  ;;  %4547 = vmatprep.subr.bf16.mxu1 %v4963_v0  ;;  %v5011_v63 = vld [vmem:[#allocation9 + $0x1f0] sm:$0xff]   ;;  %v5012_v0 = vld [vmem:[#allocation9 + $0x138] sm:$0xff]  }
 0x118   :  { %1287 = vmatpush1.bf16.msra.mxu0 %v4964_v1  ;;  %v5013_v1 = vld [vmem:[#allocation9 + $0x1b0] sm:$0xff]  }
 0x119   :  { %1288 = vmatprep.subr.bf16.mxu0 %v5455_v26  ;;  %4548 = vmatpush3.bf16.msra.mxu1 %v4965_v2  ;;  %v241_v2 = vpack.c.bf16 %v209_v44, %v209_v44  ;;  %v5043_v44 = vld [vmem:[#allocation9 + $0x248] sm:$0xff]  }
 0x11a   :  { %4549 = vmatprep.subr.bf16.mxu1 %v4966_v3  ;;  %v5014_v3 = vld [vmem:[#allocation9 + $0x1f8] sm:$0xff]  }
 0x11c   :  { %1289 = vmatpush1.bf16.msra.mxu0 %v4967_v4  ;;  %v5016_v4 = vld [vmem:[#allocation9 + $0x200] sm:$0xff]  }
 0x11d   :  { %1290 = vmatprep.subr.bf16.mxu0 %v5455_v26  ;;  %4550 = vmatpush3.bf16.msra.mxu1 %v4968_v5  ;;  %v5015_v5 = vld [vmem:[#allocation9 + $0x1b8] sm:$0xff]  }
 0x11e   :  { %4551 = vmatprep.subr.bf16.mxu1 %v4969_v8  ;;  %v243_v8 = vpack.c.bf16 %v216_v49, %v216_v49  ;;  %v5046_v49 = vld [vmem:[#allocation9 + $0x250] sm:$0xff]  }
 0x120   :  { %1291 = vmatpush1.bf16.msra.mxu0 %v4970_v9  ;;  %v5020_v9 = vld [vmem:[#allocation12] sm:$0xff]  }
 0x121   :  { %1292 = vmatprep.subr.bf16.mxu0 %v5455_v26  ;;  %4552 = vmatpush3.bf16.msra.mxu1 %v4971_v11  ;;  %v5022_v11 = vld [vmem:[#allocation9 + $0x210] sm:$0xff]  }
 0x122   :  { %4553 = vmatprep.subr.bf16.mxu1 %v4972_v12  ;;  %v1985_v12 = vld [vmem:[#allocation6] sm:$0xff] }
 0x124   :  { %1293 = vmatpush1.bf16.msra.mxu0 %v4973_v13  ;;  %v5735_v13 = vrot.slane %v1985_v12, %v5698_v35 }
 0x125   :  { %1294 = vmatprep.subr.bf16.mxu0 %v5455_v26  ;;  %4554 = vmatpush3.bf16.msra.mxu1 %v4974_v14  ;;  %v5023_v14 = vld [vmem:[#allocation12 + $0x8] sm:$0xff]  }
 0x126   :  { %4555 = vmatprep.subr.bf16.mxu1 %v4975_v15  ;;  %v5024_v15 = vld [vmem:[#allocation12 + $0x50] sm:$0xff]   ;;  %v2006_v16 = vcombine.high %v5735_v13, %v5735_v13  ;;  %v2043_v45 = vpack.c.bf16 %v5735_v13, %v5735_v13 }
 0x128   :  { %1295 = vmatpush1.bf16.msra.mxu0 %v4976_v17  ;;  %v5025_v17 = vld [vmem:[#allocation9 + $0x218] sm:$0xff]  }
 0x129   :  { %1296 = vmatprep.subr.bf16.mxu0 %v5455_v26  ;;  %4556 = vmatpush3.bf16.msra.mxu1 %v4977_v18  ;;  %v2044_v18 = vpack.c.bf16 %v2006_v16, %v2006_v16 }
 0x12a   :  { %4557 = vmatprep.subr.bf16.mxu1 %v4978_v19  ;;  %v5026_v19 = vld [vmem:[#allocation12 + $0x10] sm:$0xff]  }
 0x12c   :  { %1297 = vmatpush1.bf16.msra.mxu0 %v1106_v20  ;;  %v5027_v20 = vld [vmem:[#allocation12 + $0x58] sm:$0xff]  }
 0x12d   :  { %4567 = vmatprep.subr.bf16.mxu0 %v4982_v21  ;;  %4558 = vmatpush3.bf16.msra.mxu1 %v4980_v22  ;;  %v5028_v21 = vld [vmem:[#allocation9 + $0x220] sm:$0xff]  }
 0x12e   :  { %4559 = vmatprep.subr.bf16.mxu1 %v4981_v24  ;;  %v5029_v22 = vld [vmem:[#allocation12 + $0x18] sm:$0xff]   ;;  %v5031_v24 = vld [vmem:[#allocation9 + $0x228] sm:$0xff]  }
 0x12f   :  { %1301 = vmatmul.mubr.bf16.vlgmr.msra.gmra.mrb[8].mxu0 %v470_v23  ;;  %v5030_v23 = vld [vmem:[#allocation12 + $0x60] sm:$0xff]  }
 0x130   :  { %4568 = vmatpush3.bf16.msra.mxu0 %v4984_v25  ;;  %1897 = vmatprep.mubr.bf16.mxu0 %v242_v52  ;;  %v5032_v25 = vld [vmem:[#allocation12 + $0x20] sm:$0xff]   ;;  %v5049_v52 = vld [vmem:[#allocation9 + $0x258] sm:$0xff]  }
 0x131   :  { %4569 = vmatprep.subr.bf16.mxu0 %v4986_v27  ;;  %4560 = vmatpush3.bf16.msra.mxu1 %v4983_v28  ;;  %v5033_v27 = vld [vmem:[#allocation12 + $0x68] sm:$0xff]  }
 0x132   :  { %4589 = vmatprep.subr.bf16.mxu1 %v4987_v29  ;;  %v5034_v28 = vld [vmem:[#allocation9 + $0x230] sm:$0xff]  }
 0x133   :  { %v5035_v29 = vld [vmem:[#allocation12 + $0x28] sm:$0xff]  }
 0x134   :  { %4570 = vmatpush3.bf16.msra.mxu0 %v4988_v30  ;;  %1858 = vmatmul.mubr.bf16.vlgmr.msra.gmra.mrb[12].mxu1 %v239_v31  ;;  %v1991_v30 = vcombine.high %v1985_v12, %v1985_v12  ;;  %v5036_v31 = vld [vmem:[#allocation12 + $0x70] sm:$0xff]   ;;  %v5067_v12 = vld [vmem:[#allocation12 + $0x108] sm:$0xff]  }
 0x135   :  { %4571 = vmatprep.subr.bf16.mxu0 %v4990_v32  ;;  %4590 = vmatpush3.bf16.msra.mxu1 %v4989_v33  ;;  %v5037_v32 = vld [vmem:[#allocation9 + $0x238] sm:$0xff]   ;;  %v5743_v33 = vld.sshfl [vmem:[#allocation2 + $0x10] sm:$0x33 pattern:$0x76325410] }
 0x136   :  { %4591 = vmatprep.subr.bf16.mxu1 %v4991_v34  ;;  %1937 = vmatprep.mubr.bf16.mxu1 %v244_v56  ;;  %v226_v34 = vcombine.high %v5743_v33, %v5743_v33  ;;  %v5053_v56 = vld [vmem:[#allocation12 + $0x98] sm:$0xff]  }
 0x138   :  { %4572 = vmatpush3.bf16.msra.mxu0 %v4992_v36  ;;  %v5038_v36 = vld [vmem:[#allocation12 + $0x30] sm:$0xff]  }
 0x139   :  { %4573 = vmatprep.subr.bf16.mxu0 %v4994_v37  ;;  %4592 = vmatpush3.bf16.msra.mxu1 %v4993_v38  ;;  %v246_v37 = vpack.c.bf16 %v226_v34, %v226_v34  ;;  %v5749_v38 = vrot.slane %v1991_v30, %v5698_v35  ;;  %v5081_v30 = vld [vmem:[#allocation12 + $0x168] sm:$0xff]   ;;  %v5085_v34 = vld [vmem:[#allocation12 + $0x170] sm:$0xff]  }
 0x13a   :  { %4593 = vmatprep.subr.bf16.mxu1 %v4995_v39  ;;  %v5039_v39 = vld [vmem:[#allocation12 + $0x78] sm:$0xff]  }
 0x13b   :  { %v2007_v42 = vcombine.high %v5749_v38, %v5749_v38 }
 0x13c   :  { %4574 = vmatpush3.bf16.msra.mxu0 %v4996_v40  ;;  %v5040_v40 = vld [vmem:[#allocation9 + $0x240] sm:$0xff]  }
 0x13d   :  { %4575 = vmatprep.subr.bf16.mxu0 %v4998_v41  ;;  %4594 = vmatpush3.bf16.msra.mxu1 %v4997_v43  ;;  %v5041_v41 = vld [vmem:[#allocation12 + $0x38] sm:$0xff]   ;;  %v5042_v43 = vld [vmem:[#allocation12 + $0xc0] sm:$0xff]  }
 0x13e   :  { %4595 = vmatprep.subr.bf16.mxu1 %v4999_v46  ;;  %v5044_v46 = vld [vmem:[#allocation12 + $0x80] sm:$0xff]  }
 0x140   :  { %4576 = vmatpush3.bf16.msra.mxu0 %v5000_v47  ;;  %v2046_v47 = vpack.c.bf16 %v2007_v42, %v2007_v42  ;;  %v5091_v42 = vld [vmem:[#allocation12 + $0x138] sm:$0xff]  }
 0x141   :  { %4577 = vmatprep.subr.bf16.mxu0 %v5002_v50  ;;  %4596 = vmatpush3.bf16.msra.mxu1 %v5001_v51  ;;  %v5047_v50 = vld [vmem:[#allocation12 + $0x88] sm:$0xff]   ;;  %v5048_v51 = vld [vmem:[#allocation12 + $0xd0] sm:$0xff]  }
 0x142   :  { %4597 = vmatprep.subr.bf16.mxu1 %v5003_v54  ;;  %v5051_v54 = vld [vmem:[#allocation12 + $0xd8] sm:$0xff]  }
 0x144   :  { %4578 = vmatpush3.bf16.msra.mxu0 %v5004_v55  ;;  %v5052_v55 = vld [vmem:[#allocation9 + $0x260] sm:$0xff]  }
 0x145   :  { %4579 = vmatprep.subr.bf16.mxu0 %v5006_v57  ;;  %4598 = vmatpush3.bf16.msra.mxu1 %v5005_v58  ;;  %v5054_v57 = vld [vmem:[#allocation12 + $0xe0] sm:$0xff]   ;;  %v5058_v58 = vld [vmem:[#allocation9 + $0x270] ss:$0 sps:$4 sm:$0x11]  }
 0x146   :  { %4599 = vmatprep.subr.bf16.mxu1 %v5007_v59  ;;  %v5055_v59 = vld [vmem:[#allocation9 + $0x268] sm:$0xff]  }
 0x148   :  { %4580 = vmatpush3.bf16.msra.mxu0 %v5008_v60  ;;  %v5056_v60 = vld [vmem:[#allocation12 + $0xa0] sm:$0xff]  }
 0x149   :  { %4581 = vmatprep.subr.bf16.mxu0 %v5010_v61  ;;  %4600 = vmatpush3.bf16.msra.mxu1 %v5009_v62  ;;  %v5057_v61 = vld [vmem:[#allocation12 + $0xe8] sm:$0xff]   ;;  %v1783_v62 = vsel %vm1104_vm1, %v5058_v58, 0 }
 0x14a   :  { %4601 = vmatprep.subr.bf16.mxu1 %v5011_v63  ;;  %v5061_v63 = vld [vmem:[#allocation12 + $0x140] sm:$0xff]  }
 0x14c   :  { %4582 = vmatpush3.bf16.msra.mxu0 %v5012_v0  ;;  %v5059_v0 = vld [vmem:[#allocation12 + $0xa8] sm:$0xff]  }
 0x14d   :  { %1945 = vmatprep.subr.bf16.mxu0 %v5455_v26  ;;  %4602 = vmatpush3.bf16.msra.mxu1 %v5013_v1  ;;  %v245_v1 = vpack.c.bf16 %v5743_v33, %v5743_v33  ;;  %v5083_v33 = vld [vmem:[#allocation12 + $0x128] sm:$0xff]  }
 0x14e   :  { %4603 = vmatprep.subr.bf16.mxu1 %v5014_v3  ;;  %v1986_v3 = vld [vmem:[#allocation6 + $0x8] sm:$0xff] }
 0x14f   :  { %1898 = vmatmul.mubr.bf16.vlgmr.msra.gmra.mrb[12].mxu0 %v241_v2  ;;  %v5060_v2 = vld [vmem:[#allocation12 + $0xf0] sm:$0xff]  }
 0x150   :  { %1946 = vmatpush1.bf16.msra.mxu0 %v5016_v4  ;;  %4252 = vmatprep.mubr.msk.bf16.mxu0 %vm1100_vm0, %v246_v37  ;;  %v5063_v4 = vld [vmem:[#allocation12 + $0x100] sm:$0xff]  }
 0x151   :  { %1947 = vmatprep.subr.bf16.mxu0 %v5455_v26  ;;  %4604 = vmatpush3.bf16.msra.mxu1 %v5015_v5  ;;  %v5767_v5 = vrot.slane %v1986_v3, %v5698_v35  ;;  %v5086_v37 = vld [vmem:[#allocation12 + $0x1e0] sm:$0xff]  }
 0x152   :  { %4611 = vmatprep.subr.bf16.mxu1 %v5018_v6  ;;  %v2008_v6 = vcombine.high %v1986_v3, %v1986_v3 }
 0x154   :  { %1948 = vmatpush1.bf16.msra.mxu0 %v5019_v7  ;;  %1938 = vmatmul.mubr.bf16.vlgmr.msra.gmra.mrb[16].mxu1 %v243_v8  ;;  %v5065_v7 = vld [vmem:[#allocation12 + $0x148] sm:$0xff]   ;;  %v5062_v8 = vld [vmem:[#allocation12 + $0xb0] sm:$0xff]  }
 0x155   :  { %1949 = vmatprep.subr.bf16.mxu0 %v5455_v26  ;;  %4612 = vmatpush3.bf16.msra.mxu1 %v5020_v9  ;;  %v2023_v9 = vcombine.high %v5767_v5, %v5767_v5 }
 0x156   :  { %4613 = vmatprep.subr.bf16.mxu1 %v5021_v10  ;;  %2719 = vmatprep.mubr.bf16.mxu1 %v2044_v18  ;;  %v5772_v10 = vrot.slane %v2008_v6, %v5698_v35  ;;  %v5071_v18 = vld [vmem:[#allocation12 + $0x110] sm:$0xff]   ;;  %v5103_v6 = vld [vmem:[#allocation13 + $0x48] sm:$0xff]  }
 0x157   :  { %v2048_v13 = vpack.c.bf16 %v2023_v9, %v2023_v9  ;;  %v5796_v9 = vld.sshfl [vmem:[#allocation6 + $0x10] sm:$0x33 pattern:$0x76325410] }
 0x158   :  { %1950 = vmatpush1.bf16.msra.mxu0 %v5022_v11  ;;  %v5064_v11 = vld [vmem:[#allocation12 + $0xf8] sm:$0xff]   ;;  %v2024_v16 = vcombine.high %v5772_v10, %v5772_v10  ;;  %v2049_v3 = vpack.c.bf16 %v5772_v10, %v5772_v10  ;;  %v2032_v10 = vcombine.high %v5796_v9, %v5796_v9 }
 0x159   :  { %1951 = vmatprep.subr.bf16.mxu0 %v5455_v26  ;;  %4614 = vmatpush3.bf16.msra.mxu1 %v5023_v14  ;;  %v5069_v14 = vld [vmem:[#allocation12 + $0x150] sm:$0xff]  }
 0x15a   :  { %4615 = vmatprep.subr.bf16.mxu1 %v5024_v15  ;;  %v5066_v15 = vld [vmem:[#allocation12 + $0xb8] sm:$0xff]  }
 0x15c   :  { %1952 = vmatpush1.bf16.msra.mxu0 %v5025_v17  ;;  %v5070_v17 = vld [vmem:[#allocation12 + $0x1c0] sm:$0xff]  }
 0x15d   :  { %1953 = vmatprep.subr.bf16.mxu0 %v5455_v26  ;;  %4616 = vmatpush3.bf16.msra.mxu1 %v5026_v19  ;;  %v2045_v19 = vpack.c.bf16 %v5749_v38, %v5749_v38  ;;  %v5087_v38 = vld [vmem:[#allocation12 + $0x130] sm:$0xff]  }
 0x15e   :  { %4617 = vmatprep.subr.bf16.mxu1 %v5027_v20  ;;  %v5073_v20 = vld [vmem:[#allocation12 + $0x158] sm:$0xff]  }
 0x160   :  { %1954 = vmatpush1.bf16.msra.mxu0 %v5028_v21  ;;  %v5072_v21 = vld [vmem:[#allocation12 + $0x180] sm:$0xff]  }
 0x161   :  { %1955 = vmatprep.subr.bf16.mxu0 %v5455_v26  ;;  %4618 = vmatpush3.bf16.msra.mxu1 %v5029_v22  ;;  %v2050_v22 = vpack.c.bf16 %v2024_v16, %v2024_v16  ;;  %v5110_v16 = vld [vmem:[#allocation12 + $0x228] sm:$0xff]  }
 0x162   :  { %4619 = vmatprep.subr.bf16.mxu1 %v5030_v23  ;;  %v5074_v23 = vld [vmem:[#allocation12 + $0x1c8] sm:$0xff]  }
 0x164   :  { %1956 = vmatpush1.bf16.msra.mxu0 %v5031_v24  ;;  %v5075_v24 = vld [vmem:[#allocation12 + $0x118] sm:$0xff]  }
 0x165   :  { %1957 = vmatprep.subr.bf16.mxu0 %v5455_v26  ;;  %4620 = vmatpush3.bf16.msra.mxu1 %v5032_v25  ;;  %v5077_v25 = vld [vmem:[#allocation12 + $0x160] sm:$0xff]  }
 0x166   :  { %4621 = vmatprep.subr.bf16.mxu1 %v5033_v27  ;;  %v5076_v27 = vld [vmem:[#allocation12 + $0x188] sm:$0xff]  }
 0x168   :  { %1958 = vmatpush1.bf16.msra.mxu0 %v5034_v28  ;;  %v5078_v28 = vld [vmem:[#allocation12 + $0x1d0] sm:$0xff]  }
 0x169   :  { %1959 = vmatprep.subr.bf16.mxu0 %v5455_v26  ;;  %4622 = vmatpush3.bf16.msra.mxu1 %v5035_v29  ;;  %v5079_v29 = vld [vmem:[#allocation12 + $0x120] sm:$0xff]  }
 0x16a   :  { %4623 = vmatprep.subr.bf16.mxu1 %v5036_v31  ;;  %v5080_v31 = vld [vmem:[#allocation12 + $0x190] sm:$0xff]  }
 0x16c   :  { %1960 = vmatpush1.bf16.msra.mxu0 %v5037_v32  ;;  %v5082_v32 = vld [vmem:[#allocation12 + $0x1d8] sm:$0xff]  }
 0x16d   :  { %1961 = vmatprep.subr.bf16.mxu0 %v5455_v26  ;;  %4624 = vmatpush3.bf16.msra.mxu1 %v5038_v36  ;;  %v5084_v36 = vld [vmem:[#allocation12 + $0x198] sm:$0xff]  }
 0x16e   :  { %4625 = vmatprep.subr.bf16.mxu1 %v5039_v39  ;;  %v5089_v39 = vld [vmem:[#allocation12 + $0x178] sm:$0xff]  }
 0x170   :  { %1962 = vmatpush1.bf16.msra.mxu0 %v5040_v40  ;;  %v5088_v40 = vld [vmem:[#allocation12 + $0x1a0] sm:$0xff]  }
 0x171   :  { %1963 = vmatprep.subr.bf16.mxu0 %v5455_v26  ;;  %4626 = vmatpush3.bf16.msra.mxu1 %v5041_v41  ;;  %v5090_v41 = vld [vmem:[#allocation12 + $0x1e8] sm:$0xff]  }
 0x172   :  { %4633 = vmatprep.subr.bf16.mxu1 %v5042_v43  ;;  %v5092_v43 = vld [vmem:[#allocation12 + $0x1a8] sm:$0xff]  }
 0x174   :  { %1964 = vmatpush1.bf16.msra.mxu0 %v5043_v44  ;;  %2720 = vmatmul.mubr.bf16.vlgmr.msra.gmra.mrb[20].mxu1 %v2043_v45  ;;  %v5093_v44 = vld [vmem:[#allocation12 + $0x1f0] sm:$0xff]  }
 0x175   :  { %1965 = vmatprep.subr.bf16.mxu0 %v5455_v26  ;;  %4634 = vmatpush3.bf16.msra.mxu1 %v5044_v46  ;;  %v5095_v46 = vld [vmem:[#allocation12 + $0x200] sm:$0xff]  }
 0x176   :  { %2759 = vmatprep.mubr.bf16.mxu1 %v2046_v47  ;;  %4635 = vmatprep.subr.bf16.mxu1 %v5045_v48  ;;  %v2047_v48 = vpack.c.bf16 %v5767_v5, %v5767_v5 }
 0x178   :  { %1966 = vmatpush1.bf16.msra.mxu0 %v5046_v49  ;;  %v5780_v49 = vld [vmem:[#allocation7] sm:$0xff] }
 0x179   :  { %1967 = vmatprep.subr.bf16.mxu0 %v5455_v26  ;;  %4636 = vmatpush3.bf16.msra.mxu1 %v5047_v50 }
 0x17a   :  { %4637 = vmatprep.subr.bf16.mxu1 %v5048_v51 }
 0x17c   :  { %1968 = vmatpush1.bf16.msra.mxu0 %v5049_v52 }
 0x17d   :  { %1969 = vmatprep.subr.bf16.mxu0 %v5455_v26  ;;  %4638 = vmatpush3.bf16.msra.mxu1 %v5050_v53 }
 0x17e   :  { %4639 = vmatprep.subr.bf16.mxu1 %v5051_v54 }
 0x180   :  { %1970 = vmatpush1.bf16.msra.mxu0 %v5052_v55  ;;  %v5094_v55 = vld [vmem:[#allocation12 + $0x1b0] sm:$0xff]  }
 0x181   :  { %1971 = vmatprep.subr.bf16.mxu0 %v5455_v26  ;;  %4640 = vmatpush3.bf16.msra.mxu1 %v5053_v56 }
 0x182   :  { %4641 = vmatprep.subr.bf16.mxu1 %v5054_v57  ;;  %v5096_v57 = vld [vmem:[#allocation12 + $0x1f8] sm:$0xff]  }
 0x184   :  { %1972 = vmatpush1.bf16.msra.mxu0 %v5055_v59  ;;  %v5785_v59 = vrot.slane %v5780_v49, %v5698_v35 }
 0x185   :  { %1973 = vmatprep.subr.bf16.mxu0 %v5455_v26  ;;  %4642 = vmatpush3.bf16.msra.mxu1 %v5056_v60  ;;  %v5098_v60 = vld [vmem:[#allocation12 + $0x208] sm:$0xff]  }
 0x186   :  { %4643 = vmatprep.subr.bf16.mxu1 %v5057_v61 }
 0x188   :  { %1974 = vmatpush1.bf16.msra.mxu0 %v1783_v62 }
 0x189   :  { %4655 = vmatprep.subr.bf16.mxu0 %v5061_v63  ;;  %4644 = vmatpush3.bf16.msra.mxu1 %v5059_v0  ;;  %v5097_v63 = vld [vmem:[#allocation12 + $0x1b8] sm:$0xff]   ;;  %v2909_v0 = vcombine.high %v5785_v59, %v5785_v59 }
 0x18a   :  { %4645 = vmatprep.subr.bf16.mxu1 %v5060_v2  ;;  %v5101_v2 = vld [vmem:[#allocation12 + $0x210] sm:$0xff]  }
 0x18b   :  { %1978 = vmatmul.mubr.bf16.vlgmr.msra.gmra.mrb[16].mxu0 %v245_v1  ;;  %v5100_v1 = vld [vmem:[#allocation13 + $0x40] sm:$0xff]   ;;  %v2947_v5 = vpack.c.bf16 %v2909_v0, %v2909_v0 }
 0x18c   :  { %4656 = vmatpush3.bf16.msra.mxu0 %v5063_v4  ;;  %2799 = vmatprep.mubr.bf16.mxu0 %v2048_v13  ;;  %v5102_v4 = vld [vmem:[#allocation13] sm:$0xff]   ;;  %v2052_v13 = vpack.c.bf16 %v2032_v10, %v2032_v10  ;;  %v5144_v10 = vld [vmem:[#allocation13 + $0x148] sm:$0xff]  }
 0x18d   :  { %4657 = vmatprep.subr.bf16.mxu0 %v5065_v7  ;;  %4646 = vmatpush3.bf16.msra.mxu1 %v5062_v8  ;;  %v5104_v7 = vld [vmem:[#allocation12 + $0x218] sm:$0xff]  }
 0x18e   :  { %4647 = vmatprep.subr.bf16.mxu1 %v5064_v11  ;;  %v5105_v8 = vld [vmem:[#allocation13 + $0x8] sm:$0xff]   ;;  %v5106_v11 = vld [vmem:[#allocation13 + $0x50] sm:$0xff]   ;;  %v5136_v0 = vld [vmem:[#allocation13 + $0xe0] sm:$0xff]  }
 0x190   :  { %4658 = vmatpush3.bf16.msra.mxu0 %v5067_v12  ;;  %v5107_v12 = vld [vmem:[#allocation12 + $0x220] sm:$0xff]  }
 0x191   :  { %4659 = vmatprep.subr.bf16.mxu0 %v5069_v14  ;;  %4648 = vmatpush3.bf16.msra.mxu1 %v5066_v15  ;;  %v5108_v14 = vld [vmem:[#allocation13 + $0x10] sm:$0xff]   ;;  %v5109_v15 = vld [vmem:[#allocation13 + $0x58] sm:$0xff]  }
 0x192   :  { %4677 = vmatprep.subr.bf16.mxu1 %v5070_v17  ;;  %v5111_v17 = vld [vmem:[#allocation13 + $0x18] sm:$0xff]  }
 0x194   :  { %4660 = vmatpush3.bf16.msra.mxu0 %v5071_v18  ;;  %2760 = vmatmul.mubr.bf16.vlgmr.msra.gmra.mrb[24].mxu1 %v2045_v19  ;;  %v5112_v18 = vld [vmem:[#allocation13 + $0x60] sm:$0xff]  }
 0x195   :  { %4661 = vmatprep.subr.bf16.mxu0 %v5073_v20  ;;  %4678 = vmatpush3.bf16.msra.mxu1 %v5072_v21  ;;  %v5113_v19 = vld [vmem:[#allocation12 + $0x230] sm:$0xff]   ;;  %v5115_v21 = vld [vmem:[#allocation13 + $0x68] sm:$0xff]  }
 0x196   :  { %2839 = vmatprep.mubr.bf16.mxu1 %v2050_v22  ;;  %4679 = vmatprep.subr.bf16.mxu1 %v5074_v23  ;;  %v5114_v20 = vld [vmem:[#allocation13 + $0x20] sm:$0xff]  }
 0x197   :  { %v5116_v22 = vld [vmem:[#allocation12 + $0x238] sm:$0xff]  }
 0x198   :  { %4662 = vmatpush3.bf16.msra.mxu0 %v5075_v24  ;;  %v5117_v24 = vld [vmem:[#allocation13 + $0x28] sm:$0xff]  }
 0x199   :  { %4663 = vmatprep.subr.bf16.mxu0 %v5077_v25  ;;  %4680 = vmatpush3.bf16.msra.mxu1 %v5076_v27  ;;  %v2894_v25 = vcombine.high %v5780_v49, %v5780_v49  ;;  %v2946_v49 = vpack.c.bf16 %v5785_v59, %v5785_v59  ;;  %v5133_v59 = vld [vmem:[#allocation13 + $0xd8] sm:$0xff]  }
 0x19a   :  { %4681 = vmatprep.subr.bf16.mxu1 %v5078_v28  ;;  %v5118_v28 = vld [vmem:[#allocation13 + $0x70] sm:$0xff]  }
 0x19c   :  { %4664 = vmatpush3.bf16.msra.mxu0 %v5079_v29 }
 0x19d   :  { %4665 = vmatprep.subr.bf16.mxu0 %v5081_v30  ;;  %4682 = vmatpush3.bf16.msra.mxu1 %v5080_v31 }
 0x19e   :  { %4683 = vmatprep.subr.bf16.mxu1 %v5082_v32  ;;  %v5119_v32 = vld [vmem:[#allocation12 + $0x240] sm:$0xff]  }
 0x1a0   :  { %4666 = vmatpush3.bf16.msra.mxu0 %v5083_v33 }
 0x1a1   :  { %4667 = vmatprep.subr.bf16.mxu0 %v5085_v34  ;;  %4684 = vmatpush3.bf16.msra.mxu1 %v5084_v36 }
 0x1a2   :  { %4685 = vmatprep.subr.bf16.mxu1 %v5086_v37 }
 0x1a4   :  { %4668 = vmatpush3.bf16.msra.mxu0 %v5087_v38  ;;  %v5120_v38 = vld [vmem:[#allocation13 + $0x30] sm:$0xff]  }
 0x1a5   :  { %4669 = vmatprep.subr.bf16.mxu0 %v5089_v39  ;;  %4686 = vmatpush3.bf16.msra.mxu1 %v5088_v40  ;;  %v5810_v39 = vrot.slane %v2894_v25, %v5698_v35  ;;  %v5152_v25 = vld [vmem:[#allocation13 + $0x158] sm:$0xff]  }
 0x1a6   :  { %v4451_v45 = vpop.f32.mrb[0].mxu0  ;;  %4687 = vmatprep.subr.bf16.mxu1 %v5090_v41  ;;  %v5121_v41 = vld [vmem:[#allocation13 + $0x78] sm:$0xff]  }
 0x1a7   :  { %v4452_v47 = vpop.f32.mrb[1].mxu0  ;;  %v4473_v50 = vpop.f32.mrb[0].mxu1 }
 0x1a8   :  { %v4453_v51 = vadd.f32 %v4452_v47, %v4451_v45  ;;  %v4454_v52 = vpop.f32.mrb[2].mxu0  ;;  %4670 = vmatpush3.bf16.msra.mxu0 %v5091_v42  ;;  %v4474_v53 = vpop.f32.mrb[1].mxu1  ;;  %v5123_v45 = vld [vmem:[#allocation13 + $0x38] sm:$0xff]   ;;  %v5124_v47 = vld [vmem:[#allocation13 + $0xc0] sm:$0xff]  }
 0x1a9   :  { %v4455_v54 = vpop.f32.mrb[3].mxu0  ;;  %2847 = vmatprep.subr.bf16.mxu0 %v5455_v26  ;;  %v4475_v56 = vadd.f32 %v4474_v53, %v4473_v50  ;;  %4688 = vmatpush3.bf16.msra.mxu1 %v5092_v43  ;;  %v4476_v58 = vpop.f32.mrb[2].mxu1  ;;  %v5122_v43 = vld [vmem:[#allocation12 + $0x248] sm:$0xff]   ;;  %v5126_v50 = vld [vmem:[#allocation13 + $0x80] sm:$0xff]   ;;  %v5127_v52 = vld [vmem:[#allocation13 + $0xc8] sm:$0xff]  }
 0x1aa   :  { %4689 = vmatprep.subr.bf16.mxu1 %v5093_v44  ;;  %v4477_v61 = vpop.f32.mrb[3].mxu1  ;;  %v5128_v53 = vld [vmem:[#allocation12 + $0x258] sm:$0xff]   ;;  %v5132_v58 = vld [vmem:[#allocation13 + $0x90] sm:$0xff]  }
 0x1ab   :  { %2800 = vmatmul.mubr.bf16.vlgmr.msra.gmra.mrb[20].mxu0 %v2047_v48  ;;  %v5787_v62 = vadd.f32 %v4475_v56, %v4453_v51  ;;  %v5125_v48 = vld [vmem:[#allocation12 + $0x250] sm:$0xff]   ;;  %v5129_v54 = vld [vmem:[#allocation13 + $0x88] sm:$0xff]   ;;  %v5134_v61 = vld [vmem:[#allocation12 + $0x268] sm:$0xff]  }
 0x1ac   :  { %2848 = vmatpush1.bf16.msra.mxu0 %v5095_v46  ;;  %4333 = vmatprep.mubr.msk.bf16.mxu0 %vm1100_vm0, %v2052_v13  ;;  %v2910_v46 = vcombine.high %v5810_v39, %v5810_v39  ;;  %v5131_v56 = vld [vmem:[#allocation12 + $0x260] sm:$0xff]  }
 0x1ad   :  { %2849 = vmatprep.subr.bf16.mxu0 %v5455_v26  ;;  %4690 = vmatpush3.bf16.msra.mxu1 %v5094_v55  ;;  %v5130_v55 = vld [vmem:[#allocation13 + $0xd0] sm:$0xff]  }
 0x1ae   :  { %4691 = vmatprep.subr.bf16.mxu1 %v5096_v57  ;;  %v2949_v51 = vpack.c.bf16 %v2910_v46, %v2910_v46  ;;  %v2889_v57 = vld [vmem:[#allocation7 + $0x8] sm:$0xff]  ;;  %v5143_v13 = vld [vmem:[#allocation13 + $0xf0] sm:$0xff]   ;;  %v5841_v46 = vld.sshfl [vmem:[#allocation7 + $0x10] sm:$0x33 pattern:$0x76325410] }
 0x1b0   :  { %2850 = vmatpush1.bf16.msra.mxu0 %v5098_v60  ;;  %v5137_v60 = vld [vmem:[#allocation12 + $0x270] ss:$0 sps:$4 sm:$0x11]  }
 0x1b1   :  { %2851 = vmatprep.subr.bf16.mxu0 %v5455_v26  ;;  %4692 = vmatpush3.bf16.msra.mxu1 %v5097_v63  ;;  %v5135_v63 = vld [vmem:[#allocation13 + $0x98] sm:$0xff]  }
 0x1b2   :  { %4699 = vmatprep.subr.bf16.mxu1 %v5100_v1 }
 0x1b4   :  { %2852 = vmatpush1.bf16.msra.mxu0 %v5101_v2  ;;  %2840 = vmatmul.mubr.bf16.vlgmr.msra.gmra.mrb[28].mxu1 %v2049_v3  ;;  %v2685_v2 = vsel %vm1104_vm1, %v5137_v60, 0  ;;  %v5140_v3 = vld [vmem:[#allocation13 + $0x140] sm:$0xff]  }
 0x1b5   :  { %2853 = vmatprep.subr.bf16.mxu0 %v5455_v26  ;;  %4700 = vmatpush3.bf16.msra.mxu1 %v5102_v4  ;;  %v5138_v4 = vld [vmem:[#allocation13 + $0xa0] sm:$0xff]  }
 0x1b6   :  { %3622 = vmatprep.mubr.bf16.mxu1 %v2947_v5  ;;  %4701 = vmatprep.subr.bf16.mxu1 %v5103_v6  ;;  %v2051_v5 = vpack.c.bf16 %v5796_v9, %v5796_v9  ;;  %v5139_v6 = vld [vmem:[#allocation13 + $0xe8] sm:$0xff]   ;;  %v5145_v9 = vld [vmem:[#allocation13 + $0xb0] sm:$0xff]  }
 0x1b8   :  { %2854 = vmatpush1.bf16.msra.mxu0 %v5104_v7  ;;  %v5142_v7 = vld [vmem:[#allocation13 + $0x100] sm:$0xff]  }
 0x1b9   :  { %2855 = vmatprep.subr.bf16.mxu0 %v5455_v26  ;;  %4702 = vmatpush3.bf16.msra.mxu1 %v5105_v8 }
 0x1ba   :  { %4703 = vmatprep.subr.bf16.mxu1 %v5106_v11  ;;  %v5141_v11 = vld [vmem:[#allocation13 + $0xa8] sm:$0xff]  }
 0x1bc   :  { %2856 = vmatpush1.bf16.msra.mxu0 %v5107_v12  ;;  %v2911_v12 = vcombine.high %v2889_v57, %v2889_v57 }
 0x1bd   :  { %2857 = vmatprep.subr.bf16.mxu0 %v5455_v26  ;;  %4704 = vmatpush3.bf16.msra.mxu1 %v5108_v14  ;;  %v5146_v14 = vld [vmem:[#allocation13 + $0x108] sm:$0xff]  }
 0x1be   :  { %4705 = vmatprep.subr.bf16.mxu1 %v5109_v15 }
 0x1c0   :  { %2858 = vmatpush1.bf16.msra.mxu0 %v5110_v16  ;;  %v5148_v16 = vld [vmem:[#allocation13 + $0x150] sm:$0xff]  }
 0x1c1   :  { %2859 = vmatprep.subr.bf16.mxu0 %v5455_v26  ;;  %4706 = vmatpush3.bf16.msra.mxu1 %v5111_v17 }
 0x1c2   :  { %4707 = vmatprep.subr.bf16.mxu1 %v5112_v18 }
 0x1c4   :  { %2860 = vmatpush1.bf16.msra.mxu0 %v5113_v19 }
 0x1c5   :  { %2861 = vmatprep.subr.bf16.mxu0 %v5455_v26  ;;  %4708 = vmatpush3.bf16.msra.mxu1 %v5114_v20  ;;  %v5835_v20 = vrot.slane %v2911_v12, %v5698_v35 }
 0x1c6   :  { %v4495_v23 = vpop.f32.mrb[4].mxu0  ;;  %4709 = vmatprep.subr.bf16.mxu1 %v5115_v21  ;;  %v5147_v21 = vld [vmem:[#allocation13 + $0xf8] sm:$0xff]  }
 0x1c7   :  { %v4496_v27 = vpop.f32.mrb[5].mxu0  ;;  %v4517_v31 = vpop.f32.mrb[4].mxu1  ;;  %v2952_v12 = vpack.c.bf16 %v5835_v20, %v5835_v20 }
 0x1c8   :  { %v4497_v29 = vadd.f32 %v4496_v27, %v4495_v23  ;;  %v4498_v30 = vpop.f32.mrb[6].mxu0  ;;  %2862 = vmatpush1.bf16.msra.mxu0 %v5116_v22  ;;  %v4518_v34 = vpop.f32.mrb[5].mxu1  ;;  %v5149_v23 = vld [vmem:[#allocation13 + $0xb8] sm:$0xff]   ;;  %v5153_v27 = vld [vmem:[#allocation13 + $0x1c0] sm:$0xff]  }
 0x1c9   :  { %v4499_v33 = vpop.f32.mrb[7].mxu0  ;;  %2863 = vmatprep.subr.bf16.mxu0 %v5455_v26  ;;  %4710 = vmatpush3.bf16.msra.mxu1 %v5117_v24  ;;  %v4519_v37 = vadd.f32 %v4518_v34, %v4517_v31  ;;  %v4520_v40 = vpop.f32.mrb[6].mxu1  ;;  %v5150_v24 = vld [vmem:[#allocation13 + $0x110] sm:$0xff]   ;;  %v5156_v30 = vld [vmem:[#allocation13 + $0x160] sm:$0xff]  }
 0x1ca   :  { %v1223_v36 = vadd.f32 %v4497_v29, %v5787_v62  ;;  %4711 = vmatprep.subr.bf16.mxu1 %v5118_v28  ;;  %v4521_v42 = vpop.f32.mrb[7].mxu1  ;;  %v5823_v62 = vrot.slane %v2889_v57, %v5698_v35  ;;  %v5154_v28 = vld [vmem:[#allocation13 + $0x118] sm:$0xff]   ;;  %v2927_v29 = vcombine.high %v5835_v20, %v5835_v20  ;;  %v5155_v31 = vld [vmem:[#allocation13 + $0x180] sm:$0xff]   ;;  %v2948_v35 = vpack.c.bf16 %v5810_v39, %v5810_v39  ;;  %v5162_v40 = vld [vmem:[#allocation13 + $0x128] sm:$0xff]  }
 0x1cb   :  { %v5158_v33 = vld [vmem:[#allocation13 + $0x120] sm:$0xff]   ;;  %v5163_v39 = vld [vmem:[#allocation13 + $0x190] sm:$0xff]   ;;  %v5165_v42 = vld [vmem:[#allocation13 + $0x1d8] sm:$0xff]  }
 0x1cc   :  { %2864 = vmatpush1.bf16.msra.mxu0 %v5119_v32  ;;  %v5812_v44 = vadd.f32 %v4519_v37, %v1223_v36  ;;  %v2926_v1 = vcombine.high %v5823_v62, %v5823_v62  ;;  %v5157_v32 = vld [vmem:[#allocation13 + $0x1c8] sm:$0xff]   ;;  %v2953_v34 = vpack.c.bf16 %v2927_v29, %v2927_v29 }
 0x1cd   :  { %2865 = vmatprep.subr.bf16.mxu0 %v5455_v26  ;;  %4712 = vmatpush3.bf16.msra.mxu1 %v5120_v38  ;;  %v5160_v36 = vld [vmem:[#allocation13 + $0x168] sm:$0xff]   ;;  %v5161_v38 = vld [vmem:[#allocation13 + $0x1d0] sm:$0xff]  }
 0x1ce   :  { %4713 = vmatprep.subr.bf16.mxu1 %v5121_v41  ;;  %v2951_v8 = vpack.c.bf16 %v2926_v1, %v2926_v1  ;;  %v5159_v37 = vld [vmem:[#allocation13 + $0x188] sm:$0xff]   ;;  %v5164_v41 = vld [vmem:[#allocation13 + $0x170] sm:$0xff]  }
 0x1cf   :  { %v5177_v1 = vld [vmem:[#allocation13 + $0x208] sm:$0xff]  }
 0x1d0   :  { %2866 = vmatpush1.bf16.msra.mxu0 %v5122_v43  ;;  %v5166_v43 = vld [vmem:[#allocation13 + $0x130] sm:$0xff]  }
 0x1d1   :  { %2867 = vmatprep.subr.bf16.mxu0 %v5455_v26  ;;  %4714 = vmatpush3.bf16.msra.mxu1 %v5123_v45  ;;  %v5168_v45 = vld [vmem:[#allocation13 + $0x178] sm:$0xff]  }
 0x1d2   :  { %4721 = vmatprep.subr.bf16.mxu1 %v5124_v47  ;;  %v5167_v47 = vld [vmem:[#allocation13 + $0x198] sm:$0xff]  }
 0x1d4   :  { %2868 = vmatpush1.bf16.msra.mxu0 %v5125_v48  ;;  %3623 = vmatmul.mubr.bf16.vlgmr.msra.gmra.mrb[32].mxu1 %v2946_v49  ;;  %v5169_v48 = vld [vmem:[#allocation13 + $0x1e0] sm:$0xff]   ;;  %v5170_v49 = vld [vmem:[#allocation13 + $0x138] sm:$0xff]  }
 0x1d5   :  { %2869 = vmatprep.subr.bf16.mxu0 %v5455_v26  ;;  %4722 = vmatpush3.bf16.msra.mxu1 %v5126_v50  ;;  %v2935_v50 = vcombine.high %v5841_v46, %v5841_v46 }
 0x1d6   :  { %3662 = vmatprep.mubr.bf16.mxu1 %v2949_v51  ;;  %4723 = vmatprep.subr.bf16.mxu1 %v5127_v52  ;;  %v5171_v52 = vld [vmem:[#allocation13 + $0x1a0] sm:$0xff]  }
 0x1d8   :  { %2870 = vmatpush1.bf16.msra.mxu0 %v5128_v53 }
 0x1d9   :  { %2871 = vmatprep.subr.bf16.mxu0 %v5455_v26  ;;  %4724 = vmatpush3.bf16.msra.mxu1 %v5129_v54 }
 0x1da   :  { %4725 = vmatprep.subr.bf16.mxu1 %v5130_v55  ;;  %v2950_v55 = vpack.c.bf16 %v5823_v62, %v5823_v62 }
 0x1dc   :  { %2872 = vmatpush1.bf16.msra.mxu0 %v5131_v56  ;;  %v5172_v56 = vld [vmem:[#allocation13 + $0x1e8] sm:$0xff]  }
 0x1dd   :  { %2873 = vmatprep.subr.bf16.mxu0 %v5455_v26  ;;  %4726 = vmatpush3.bf16.msra.mxu1 %v5132_v58  ;;  %v5174_v58 = vld [vmem:[#allocation13 + $0x200] sm:$0xff]  }
 0x1de   :  { %4727 = vmatprep.subr.bf16.mxu1 %v5133_v59  ;;  %v2955_v59 = vpack.c.bf16 %v2935_v50, %v2935_v50 }
 0x1e0   :  { %2874 = vmatpush1.bf16.msra.mxu0 %v5134_v61 }
 0x1e1   :  { %2875 = vmatprep.subr.bf16.mxu0 %v5455_v26  ;;  %4728 = vmatpush3.bf16.msra.mxu1 %v5135_v63  ;;  %v5173_v63 = vld [vmem:[#allocation13 + $0x1a8] sm:$0xff]  }
 0x1e2   :  { %4729 = vmatprep.subr.bf16.mxu1 %v5136_v0 }
 0x1e4   :  { %2876 = vmatpush1.bf16.msra.mxu0 %v2685_v2 }
 0x1e5   :  { %4743 = vmatprep.subr.bf16.mxu0 %v5140_v3  ;;  %4730 = vmatpush3.bf16.msra.mxu1 %v5138_v4  ;;  %v5176_v3 = vld [vmem:[#allocation13 + $0x1b0] sm:$0xff]  }
 0x1e6   :  { %4731 = vmatprep.subr.bf16.mxu1 %v5139_v6 }
 0x1e7   :  { %2880 = vmatmul.mubr.bf16.vlgmr.msra.gmra.mrb[24].mxu0 %v2051_v5  ;;  %v4539_v15 = vpop.f32.mrb[8].mxu1  ;;  %v5178_v5 = vld [vmem:[#allocation13 + $0x1f8] sm:$0xff]  }
 0x1e8   :  { %4744 = vmatpush3.bf16.msra.mxu0 %v5142_v7  ;;  %3702 = vmatprep.mubr.bf16.mxu0 %v2951_v8  ;;  %v4540_v17 = vpop.f32.mrb[9].mxu1  ;;  %v5180_v8 = vld [vmem:[#allocation13 + $0x210] sm:$0xff]  }
 0x1e9   :  { %4745 = vmatprep.subr.bf16.mxu0 %v5144_v10  ;;  %4732 = vmatpush3.bf16.msra.mxu1 %v5141_v11  ;;  %v5832_v18 = vadd.f32 %v4540_v17, %v4539_v15  ;;  %v4542_v19 = vpop.f32.mrb[10].mxu1  ;;  %v5179_v10 = vld [vmem:[#allocation13 + $0x1b8] sm:$0xff]   ;;  %v5184_v15 = vld [vmem:[#allocation13 + $0x228] sm:$0xff]  }
 0x1ea   :  { %4733 = vmatprep.subr.bf16.mxu1 %v5143_v13  ;;  %v4543_v22 = vpop.f32.mrb[11].mxu1  ;;  %v5182_v11 = vld [vmem:[#allocation13 + $0x218] sm:$0xff]   ;;  %v5456_v13 = vmov 0.0  }
 0x1eb   :  { %v5186_v17 = vld [vmem:[#allocation13 + $0x238] sm:$0xff]  }
 0x1ec   :  { %4746 = vmatpush3.bf16.msra.mxu0 %v5146_v14  ;;  %v5183_v14 = vld [vmem:[#allocation13 + $0x220] sm:$0xff]  }
 0x1ed   :  { %4747 = vmatprep.subr.bf16.mxu0 %v5148_v16  ;;  %4734 = vmatpush3.bf16.msra.mxu1 %v5145_v9  ;;  %v5185_v16 = vld [vmem:[#allocation13 + $0x230] sm:$0xff]  }
 0x1ee   :  { %4735 = vmatprep.subr.bf16.mxu1 %v5147_v21  ;;  %v5187_v21 = vld [vmem:[#allocation13 + $0x240] sm:$0xff]  }
 0x1f0   :  { %4748 = vmatpush3.bf16.msra.mxu0 %v5150_v24 }
 0x1f1   :  { %4749 = vmatprep.subr.bf16.mxu0 %v5152_v25  ;;  %4736 = vmatpush3.bf16.msra.mxu1 %v5149_v23  ;;  %v5188_v25 = vld [vmem:[#allocation13 + $0x248] sm:$0xff]  }
 0x1f2   :  { %4765 = vmatprep.subr.bf16.mxu1 %v5153_v27 }
 0x1f4   :  { %4750 = vmatpush3.bf16.msra.mxu0 %v5154_v28  ;;  %3663 = vmatmul.mubr.bf16.vlgmr.msra.gmra.mrb[36].mxu1 %v2948_v35 }
 0x1f5   :  { %4751 = vmatprep.subr.bf16.mxu0 %v5156_v30  ;;  %4766 = vmatpush3.bf16.msra.mxu1 %v5155_v31  ;;  %v5189_v31 = vld [vmem:[#allocation13 + $0x250] sm:$0xff]  }
 0x1f6   :  { %3742 = vmatprep.mubr.bf16.mxu1 %v2953_v34  ;;  %4767 = vmatprep.subr.bf16.mxu1 %v5157_v32  ;;  %v5190_v32 = vld [vmem:[#allocation13 + $0x258] sm:$0xff]   ;;  %v5192_v34 = vld [vmem:[#allocation13 + $0x268] sm:$0xff]  }
 0x1f8   :  { %4752 = vmatpush3.bf16.msra.mxu0 %v5158_v33  ;;  %v5191_v33 = vld [vmem:[#allocation13 + $0x260] sm:$0xff]  }
 0x1f9   :  { %4753 = vmatprep.subr.bf16.mxu0 %v5160_v36  ;;  %4768 = vmatpush3.bf16.msra.mxu1 %v5159_v37  ;;  %v5193_v36 = vld [vmem:[#allocation13 + $0x270] ss:$0 sps:$4 sm:$0x11]   ;;  %v5458_v37 = vmov 65535  }
 0x1fa   :  { %4769 = vmatprep.subr.bf16.mxu1 %v5161_v38  ;;  %v3800_v38 = vsel %vm3798_vm3, 4294967295, %v5458_v37 }
 0x1fc   :  { %4754 = vmatpush3.bf16.msra.mxu0 %v5162_v40  ;;  %v3588_v40 = vsel %vm1104_vm1, %v5193_v36, 0 }
 0x1fd   :  { %4755 = vmatprep.subr.bf16.mxu0 %v5164_v41  ;;  %4770 = vmatpush3.bf16.msra.mxu1 %v5163_v39  ;;  %v3793_v41 = vld [vmem:[%s5920_s9] sm:$0x7]  ;;  %v3801_v39 = vsel %vm3799_vm4, %v3800_v38, 0 }
 0x1fe   :  { %4771 = vmatprep.subr.bf16.mxu1 %v5165_v42  ;;  %v2954_v42 = vpack.c.bf16 %v5841_v46, %v5841_v46 }
 0x200   :  { %4756 = vmatpush3.bf16.msra.mxu0 %v5166_v43  ;;  %v3803_v43 = vand.u32 %v3801_v39, %v3793_v41 }
 0x201   :  { %4757 = vmatprep.subr.bf16.mxu0 %v5168_v45  ;;  %4772 = vmatpush3.bf16.msra.mxu1 %v5167_v47 }
 0x202   :  { %v1302_v51 = vpop.f32.mrb[8].mxu0  ;;  %4773 = vmatprep.subr.bf16.mxu1 %v5169_v48 }
 0x203   :  { %v1303_v53 = vadd.f32 %v1302_v51, %v5812_v44  ;;  %v1304_v54 = vpop.f32.mrb[9].mxu0  ;;  %v5175_v44 = vld [vmem:[#allocation13 + $0x1f0] sm:$0xff]  }
 0x204   :  { %v1305_v57 = vpop.f32.mrb[10].mxu0  ;;  %4758 = vmatpush3.bf16.msra.mxu0 %v5170_v49 }
 0x205   :  { %v1820_v60 = vadd.f32 %v5832_v18, %v1303_v53  ;;  %v1306_v61 = vpop.f32.mrb[11].mxu0  ;;  %3750 = vmatprep.subr.bf16.mxu0 %v5455_v26  ;;  %4774 = vmatpush3.bf16.msra.mxu1 %v5171_v52 }
 0x206   :  { %4775 = vmatprep.subr.bf16.mxu1 %v5172_v56 }
 0x207   :  { %3703 = vmatmul.mubr.bf16.vlgmr.msra.gmra.mrb[28].mxu0 %v2950_v55  ;;  %v4561_v0 = vpop.f32.mrb[12].mxu1 }
 0x208   :  { %3751 = vmatpush1.bf16.msra.mxu0 %v5174_v58  ;;  %4414 = vmatprep.mubr.msk.bf16.mxu0 %vm1100_vm0, %v2955_v59  ;;  %v4562_v62 = vpop.f32.mrb[13].mxu1 }
 0x209   :  { %3752 = vmatprep.subr.bf16.mxu0 %v5455_v26  ;;  %v4563_v2 = vadd.f32 %v4562_v62, %v4561_v0  ;;  %4776 = vmatpush3.bf16.msra.mxu1 %v5173_v63  ;;  %v4564_v4 = vpop.f32.mrb[14].mxu1  ;;  %v5196_v0 = vld [vmem:[#allocation15 + $0x10] sm:$0xff]  }
 0x20a   :  { %4777 = vmatprep.subr.bf16.mxu1 %v5175_v44  ;;  %v4565_v6 = vpop.f32.mrb[15].mxu1  ;;  %v5195_v44 = vld [vmem:[#allocation15 + $0x8] sm:$0xff]  }
 0x20b   :  { %v1860_v7 = vadd.f32 %v4563_v2, %v1820_v60  ;;  %v5194_v60 = vld [vmem:[#allocation15] sm:$0xff]  }
 0x20c   :  { %3753 = vmatpush1.bf16.msra.mxu0 %v5177_v1  ;;  %v5197_v1 = vld [vmem:[#allocation15 + $0x18] sm:$0xff]  }
 0x20d   :  { %3754 = vmatprep.subr.bf16.mxu0 %v5455_v26  ;;  %4778 = vmatpush3.bf16.msra.mxu1 %v5176_v3 }
 0x20e   :  { %4779 = vmatprep.subr.bf16.mxu1 %v5178_v5 }
 0x210   :  { %3755 = vmatpush1.bf16.msra.mxu0 %v5180_v8 }
 0x211   :  { %3756 = vmatprep.subr.bf16.mxu0 %v5455_v26  ;;  %4780 = vmatpush3.bf16.msra.mxu1 %v5179_v10 }
 0x212   :  { %4813 = vmatprep.subr.bf16.mxu1 %v5456_v13 }
 0x214   :  { %3757 = vmatpush1.bf16.msra.mxu0 %v5182_v11  ;;  %3743 = vmatmul.mubr.bf16.vlgmr.msra.gmra.mrb[40].mxu1 %v2952_v12 }
 0x215   :  { %3758 = vmatprep.subr.bf16.mxu0 %v5455_v26  ;;  %4829 = vmatprep.mubr.msk.bf16.mxu1 %vm5457_vm2, %v5456_v13 }
 0x216   :  { %4814 = vmatpush3.bf16.msra.mxu1 %v5194_v60 }
 0x217   :  { %4815 = vmatprep.subr.bf16.mxu1 %v5456_v13 }
 0x218   :  { %3759 = vmatpush1.bf16.msra.mxu0 %v5183_v14 }
 0x219   :  { %3760 = vmatprep.subr.bf16.mxu0 %v5455_v26 }
 0x21a   :  { %4816 = vmatpush3.bf16.msra.mxu1 %v5195_v44 }
 0x21b   :  { %4817 = vmatprep.subr.bf16.mxu1 %v5456_v13 }
 0x21c   :  { %3761 = vmatpush1.bf16.msra.mxu0 %v5184_v15  ;;  %v5198_v15 = vld [vmem:[#allocation15 + $0x20] sm:$0xff]  }
 0x21d   :  { %3762 = vmatprep.subr.bf16.mxu0 %v5455_v26 }
 0x21e   :  { %4818 = vmatpush3.bf16.msra.mxu1 %v5196_v0  ;;  %v5203_v0 = vld [vmem:[#allocation16 + $0x8] sm:$0xff]  }
 0x21f   :  { %4819 = vmatprep.subr.bf16.mxu1 %v5456_v13 }
 0x220   :  { %3763 = vmatpush1.bf16.msra.mxu0 %v5185_v16  ;;  %v5199_v16 = vld [vmem:[#allocation15 + $0x28] sm:$0xff]  }
 0x221   :  { %3764 = vmatprep.subr.bf16.mxu0 %v5455_v26 }
 0x222   :  { %v4583_v9 = vpop.f32.mrb[12].mxu0  ;;  %4820 = vmatpush3.bf16.msra.mxu1 %v5197_v1  ;;  %v5204_v1 = vld [vmem:[#allocation16 + $0x10] sm:$0xff]  }
 0x223   :  { %v4584_v18 = vpop.f32.mrb[13].mxu0  ;;  %4821 = vmatprep.subr.bf16.mxu1 %v5456_v13 }
 0x224   :  { %v4585_v19 = vadd.f32 %v4584_v18, %v4583_v9  ;;  %v4586_v20 = vpop.f32.mrb[14].mxu0  ;;  %3765 = vmatpush1.bf16.msra.mxu0 %v5186_v17  ;;  %v5200_v17 = vld [vmem:[#allocation15 + $0x30] sm:$0xff]   ;;  %v5201_v9 = vld [vmem:[#allocation15 + $0x38] sm:$0xff]  }
 0x225   :  { %v4587_v22 = vpop.f32.mrb[15].mxu0  ;;  %3766 = vmatprep.subr.bf16.mxu0 %v5455_v26 }
 0x226   :  { %v1900_v23 = vadd.f32 %v4585_v19, %v1860_v7  ;;  %4822 = vmatpush3.bf16.msra.mxu1 %v5198_v15 }
 0x227   :  { %v4605_v24 = vpop.f32.mrb[16].mxu1  ;;  %4823 = vmatprep.subr.bf16.mxu1 %v5456_v13 }
 0x228   :  { %3767 = vmatpush1.bf16.msra.mxu0 %v5187_v21  ;;  %v4606_v27 = vpop.f32.mrb[17].mxu1 }
 0x229   :  { %3768 = vmatprep.subr.bf16.mxu0 %v5455_v26  ;;  %v4607_v28 = vadd.f32 %v4606_v27, %v4605_v24  ;;  %v4608_v29 = vpop.f32.mrb[18].mxu1 }
 0x22a   :  { %v4609_v30 = vpop.f32.mrb[19].mxu1  ;;  %4824 = vmatpush3.bf16.msra.mxu1 %v5199_v16  ;;  %v4426_v16 = vld [vmem:[%s5925_s14] ss:$0 sm:$0xff] }
 0x22b   :  { %v1940_v35 = vadd.f32 %v4607_v28, %v1900_v23  ;;  %4825 = vmatprep.subr.bf16.mxu1 %v5456_v13 }
 0x22c   :  { %3769 = vmatpush1.bf16.msra.mxu0 %v5188_v25 }
 0x22d   :  { %3770 = vmatprep.subr.bf16.mxu0 %v5455_v26 }
 0x22e   :  { %4826 = vmatpush3.bf16.msra.mxu1 %v5200_v17 }
 0x22f   :  { %4827 = vmatprep.subr.bf16.mxu1 %v5456_v13 }
 0x230   :  { %3771 = vmatpush1.bf16.msra.mxu0 %v5189_v31 }
 0x231   :  { %3772 = vmatprep.subr.bf16.mxu0 %v5455_v26 }
 0x232   :  { %4828 = vmatpush3.bf16.msra.mxu1 %v5201_v9 }
 0x233   :  { %4833 = vmatprep.subr.bf16.mxu1 %v5456_v13 }
 0x234   :  { %3773 = vmatpush1.bf16.msra.mxu0 %v5190_v32 }
 0x235   :  { %3774 = vmatprep.subr.bf16.mxu0 %v5455_v26 }
 0x238   :  { %3775 = vmatpush1.bf16.msra.mxu0 %v5191_v33 }
 0x239   :  { %3776 = vmatprep.subr.bf16.mxu0 %v5455_v26 }
 0x23c   :  { %3777 = vmatpush1.bf16.msra.mxu0 %v5192_v34 }
 0x23d   :  { %3778 = vmatprep.subr.bf16.mxu0 %v5455_v26  ;;  %v3791_v26 = vld [vmem:[%s5915_s4] sm:$0x3] }
 0x23e   :  { %v3792_v45 = vpack.c.bf16 %v3791_v26, %v3791_v26 }
 0x240   :  { %3779 = vmatpush1.bf16.msra.mxu0 %v3588_v40 }
 0x241   :  { %4807 = vmatprep.subr.bf16.mxu0 %v5456_v13 }
 0x243   :  { %3783 = vmatmul.mubr.bf16.vlgmr.msra.gmra.mrb[32].mxu0 %v2954_v42 }
 0x244   :  { %4808 = vmatpush3.bf16.msra.mxu0 %v3803_v43  ;;  %4809 = vmatprep.mubr.msk.bf16.mxu0 %vm5457_vm2, %v5456_v13 }
 0x247   :  { %v4627_v47 = vpop.f32.mrb[20].mxu1 }
 0x248   :  { %v4628_v48 = vpop.f32.mrb[21].mxu1 }
 0x249   :  { %v4629_v49 = vadd.f32 %v4628_v48, %v4627_v47  ;;  %v4630_v50 = vpop.f32.mrb[22].mxu1 }
 0x24a   :  { %v4631_v46 = vpop.f32.mrb[23].mxu1 }
 0x24b   :  { %4810 = vmatmul.mubr.msk.bf16.vlgmr.msra.gmra.mrb[36].mxu0 %vm3794_vm5, %v3792_v45 }
 0x25e   :  { %v1979_v51 = vpop.f32.mrb[16].mxu0 }
 0x25f   :  { %v1980_v52 = vadd.f32 %v1979_v51, %v1940_v35  ;;  %v1981_v53 = vpop.f32.mrb[17].mxu0 }
 0x260   :  { %v1982_v54 = vpop.f32.mrb[18].mxu0 }
 0x261   :  { %v1983_v55 = vpop.f32.mrb[19].mxu0 }
 0x262   :  { %v4416_v55 = vld [vmem:[%s5921_s10] ss:$0 sm:$0xff] }
 0x267   :  { %v4649_v56 = vpop.f32.mrb[24].mxu1 }
 0x268   :  { %v4650_v57 = vpop.f32.mrb[25].mxu1 }
 0x269   :  { %v4651_v58 = vadd.f32 %v4650_v57, %v4649_v56  ;;  %v4652_v59 = vpop.f32.mrb[26].mxu1 }
 0x26a   :  { %v4653_v61 = vpop.f32.mrb[27].mxu1 }
 0x26b   :  { %v2762_v63 = vadd.f32 %v4651_v58, %v4629_v49 }
 0x27e   :  { %v4671_v62 = vpop.f32.mrb[20].mxu0 }
 0x27f   :  { %v4672_v2 = vpop.f32.mrb[21].mxu0 }
 0x280   :  { %v4673_v3 = vadd.f32 %v4672_v2, %v4671_v62  ;;  %v4674_v4 = vpop.f32.mrb[22].mxu0  ;;  %v5205_v62 = vld [vmem:[#allocation16 + $0x18] sm:$0xff]   ;;  %v5206_v2 = vld [vmem:[#allocation16 + $0x20] sm:$0xff]  }
 0x281   :  { %v4675_v5 = vpop.f32.mrb[23].mxu0  ;;  %v5208_v4 = vld [vmem:[#allocation16 + $0x30] sm:$0xff]  }
 0x282   :  { %v2802_v6 = vadd.f32 %v4673_v3, %v2762_v63  ;;  %v5202_v63 = vld [vmem:[#allocation16] sm:$0xff]   ;;  %v5207_v3 = vld [vmem:[#allocation16 + $0x28] sm:$0xff]   ;;  %v5209_v5 = vld [vmem:[#allocation16 + $0x38] sm:$0xff]  }
 0x287   :  { %v4693_v7 = vpop.f32.mrb[28].mxu1 }
 0x288   :  { %v4694_v8 = vpop.f32.mrb[29].mxu1 }
 0x289   :  { %v4695_v10 = vadd.f32 %v4694_v8, %v4693_v7  ;;  %v4696_v11 = vpop.f32.mrb[30].mxu1 }
 0x28a   :  { %v4697_v12 = vpop.f32.mrb[31].mxu1 }
 0x28b   :  { %v2842_v14 = vadd.f32 %v4695_v10, %v2802_v6  ;;  %v4417_v6 = vld [vmem:[%s5923_s12] ss:$0 sm:$0xff] }
 0x2a7   :  { %v4715_v18 = vpop.f32.mrb[32].mxu1 }
 0x2a8   :  { %v4716_v19 = vpop.f32.mrb[33].mxu1 }
 0x2a9   :  { %v4717_v20 = vadd.f32 %v4716_v19, %v4715_v18  ;;  %v4718_v21 = vpop.f32.mrb[34].mxu1 }
 0x2aa   :  { %v4719_v22 = vpop.f32.mrb[35].mxu1 }
 0x2ba   :  { %v2881_v23 = vpop.f32.mrb[24].mxu0 }
 0x2bb   :  { %v2882_v24 = vadd.f32 %v2881_v23, %v2842_v14  ;;  %v2883_v25 = vpop.f32.mrb[25].mxu0 }
 0x2bc   :  { %v2884_v27 = vpop.f32.mrb[26].mxu0 }
 0x2bd   :  { %v2887_v28 = vadd.f32 %v2882_v24, %v1980_v52  ;;  %v2885_v29 = vpop.f32.mrb[27].mxu0 }
 0x2c7   :  { %v4737_v30 = vpop.f32.mrb[36].mxu1 }
 0x2c8   :  { %v4738_v31 = vpop.f32.mrb[37].mxu1 }
 0x2c9   :  { %v4739_v35 = vadd.f32 %v4738_v31, %v4737_v30  ;;  %v4740_v32 = vpop.f32.mrb[38].mxu1 }
 0x2ca   :  { %v4741_v33 = vpop.f32.mrb[39].mxu1 }
 0x2cb   :  { %v3665_v34 = vadd.f32 %v4739_v35, %v4717_v20 }
 0x2da   :  { %v4759_v36 = vpop.f32.mrb[28].mxu0 }
 0x2db   :  { %v4760_v37 = vpop.f32.mrb[29].mxu0 }
 0x2dc   :  { %v4761_v38 = vadd.f32 %v4760_v37, %v4759_v36  ;;  %v4762_v40 = vpop.f32.mrb[30].mxu0 }
 0x2dd   :  { %v4763_v41 = vpop.f32.mrb[31].mxu0 }
 0x2de   :  { %v3705_v39 = vadd.f32 %v4761_v38, %v3665_v34 }
 0x2e7   :  { %v4781_v42 = vpop.f32.mrb[40].mxu1 }
 0x2e8   :  { %v4782_v43 = vpop.f32.mrb[41].mxu1 }
 0x2e9   :  { %v4783_v26 = vadd.f32 %v4782_v43, %v4781_v42  ;;  %v4784_v45 = vpop.f32.mrb[42].mxu1 }
 0x2ea   :  { %v4785_v47 = vpop.f32.mrb[43].mxu1 }
 0x2eb   :  { %v3745_v48 = vadd.f32 %v4783_v26, %v3705_v39 }
 0x316   :  { %v3784_v49 = vpop.f32.mrb[32].mxu0 }
 0x317   :  { %v3785_v50 = vadd.f32 %v3784_v49, %v3745_v48  ;;  %v3786_v46 = vpop.f32.mrb[33].mxu0 }
 0x318   :  { %v3787_v51 = vpop.f32.mrb[34].mxu0 }
 0x319   :  { %v3788_v52 = vpop.f32.mrb[35].mxu0  ;;  %v3790_v53 = vadd.f32 %v3785_v50, %v2887_v28 }
 0x31e   :  { %v3839_v54 = vpop.f32.mrb[36].mxu0 }
 0x31f   :  { %v3845_v56 = vadd.f32 %v3839_v54, %v3790_v53  ;;  %v4811_v57 = vpop.f32.mrb[37].mxu0 }
 0x320   :  { %v3842_v58 = vpop.f32.mrb[38].mxu0 }
 0x321   :  { %v3853_v59 = vadd.f32 %v4416_v55, %v3845_v56  ;;  %v4812_v60 = vpop.f32.mrb[39].mxu0 }
 0x323   :  { %v3854_v61 = vmax.f32 %v3853_v59, 0.0 }
 0x325   :  { %v3855_v44 = vpack.c.bf16 %v3854_v61, %v3854_v61 }
 0x327   :  { %4830 = vmatmul.mubr.bf16.vlgmr.msra.gmra.mrb[44].mxu1 %v3855_v44 }
 0x328   :  { %4834 = vmatpush3.bf16.msra.mxu1 %v5202_v63  ;;  %4849 = vmatprep.mubr.msk.bf16.mxu1 %vm5457_vm2, %v5456_v13 }
 0x329   :  { %4835 = vmatprep.subr.bf16.mxu1 %v5456_v13 }
 0x32c   :  { %4836 = vmatpush3.bf16.msra.mxu1 %v5203_v0 }
 0x32d   :  { %4837 = vmatprep.subr.bf16.mxu1 %v5456_v13 }
 0x330   :  { %4838 = vmatpush3.bf16.msra.mxu1 %v5204_v1 }
 0x331   :  { %4839 = vmatprep.subr.bf16.mxu1 %v5456_v13 }
 0x334   :  { %4840 = vmatpush3.bf16.msra.mxu1 %v5205_v62 }
 0x335   :  { %4841 = vmatprep.subr.bf16.mxu1 %v5456_v13 }
 0x338   :  { %4842 = vmatpush3.bf16.msra.mxu1 %v5206_v2 }
 0x339   :  { %4843 = vmatprep.subr.bf16.mxu1 %v5456_v13 }
 0x33c   :  { %4844 = vmatpush3.bf16.msra.mxu1 %v5207_v3 }
 0x33d   :  { %4845 = vmatprep.subr.bf16.mxu1 %v5456_v13 }
 0x340   :  { %4846 = vmatpush3.bf16.msra.mxu1 %v5208_v4 }
 0x341   :  { %4847 = vmatprep.subr.bf16.mxu1 %v5456_v13 }
 0x344   :  { %4848 = vmatpush3.bf16.msra.mxu1 %v5209_v5 }
 0x3fa   :  { %v3961_v7 = vpop.f32.mrb[44].mxu1 }
 0x3fb   :  { %v3962_v8 = vadd.f32 %v4417_v6, %v3961_v7  ;;  %v4831_v10 = vpop.f32.mrb[45].mxu1 }
 0x3fc   :  { %v3964_v11 = vpop.f32.mrb[46].mxu1 }
 0x3fd   :  { %v3967_v12 = vmax.f32 %v3962_v8, 0.0  ;;  %v4832_v14 = vpop.f32.mrb[47].mxu1 }
 0x3ff   :  { %v3968_v15 = vpack.c.bf16 %v3967_v12, %v3967_v12 }
 0x401   :  { %4850 = vmatmul.mubr.bf16.vlgmr.msra.gmra.mrb[48].mxu1 %v3968_v15 }
 0x4d4   :  { %v4074_v17 = vpop.f32.mrb[48].mxu1 }
 0x4d5   :  { %v4075_v13 = vadd.f32 %v4426_v16, %v4074_v17  ;;  %v4851_v9 = vpop.f32.mrb[49].mxu1 }
 0x4d6   :  { %v4077_v18 = vpop.f32.mrb[50].mxu1 }
 0x4d7   :  { %4080 = vst [vmem:[%s5926_s15] sm:$0x3] %v4075_v13  ;;  %v4852_v19 = vpop.f32.mrb[51].mxu1 }
 0x4d8   :  { %4085 = vsyncpa [#allocation3], 1 }
 0x4d9   :  { %4086 = vsyncpa [#allocation5], 1 }
 0x4da   :  { %4087 = vsyncpa [#allocation8], 1 }
 0x4db   :  { %4088 = vsyncpa [#allocation11], 1 }
 0x4dc   :  { %4089 = vsyncpa [#allocation14], 1 }
 0x4dd   :  { %4090 = vsyncpa [#allocation17], 1 }

</bundles_post_ra>
